<compile_context>
chip_gen: v5e
topology: v5e:2x2
jax: 0.10.0
libtpu: 0.0.40
codegen_flags: <defaults>
</compile_context>

<pallas_src>
import functools

import jax
import jax.numpy as jnp
from jax.experimental import pallas as pl
from jax.experimental.pallas import tpu as pltpu

D_MODEL = 256
HEADS = 4
DIM_HEAD = 64
INNER = HEADS * DIM_HEAD          # 256 (== D_MODEL, required by the reshape)
LN_EPS = 1e-5
NORM_EPS = 1e-12                  # F.normalize default eps
INV_SQRT2 = 0.7071067811865476


def _erf(x):
    # Abramowitz & Stegun 7.1.26 polynomial approximation, |err| <= 1.5e-7.
    # (erf has no guaranteed Mosaic lowering; exp / rcp are EUP-native.)
    a1, a2, a3, a4, a5 = 0.254829592, -0.284496736, 1.421413741, -1.453152027, 1.061405429
    p = 0.3275911
    s = jnp.where(x >= 0.0, 1.0, -1.0)
    ax = jnp.abs(x)
    t = pl.reciprocal(1.0 + p * ax, approx=True)   # EUP rcp; ~2^-12 rel err is negligible here
    poly = ((((a5 * t + a4) * t + a3) * t + a2) * t + a1) * t
    return s * (1.0 - poly * jnp.exp(-ax * ax))


def _encoder_layer_kernel(scale_ref, x_ref, wqkv_ref, bqkv_ref, wout_ref,
                          gamma_ref, beta_ref, o_ref, *, compute_dtype, kv_tile):
    Bb, N, C = x_ref.shape
    M = Bb * N
    n_kv_tiles = (N + kv_tile - 1) // kv_tile

    x = x_ref[...]                                  # (Bb, N, C) f32
    xf = x.reshape(M, C)                            # (M, C)

    # ---- to_qkv: Linear(C, 3*INNER, bias=True) ---- (bf16 MXU, f32 acc)
    qkv = jnp.dot(xf.astype(compute_dtype), wqkv_ref[...],
                  preferred_element_type=jnp.float32) + bqkv_ref[...]   # (M, 3*INNER) f32

    head_outs = []
    for h in range(HEADS):
        q = qkv[:, 0 * INNER + h * DIM_HEAD: 0 * INNER + (h + 1) * DIM_HEAD]
        k = qkv[:, 1 * INNER + h * DIM_HEAD: 1 * INNER + (h + 1) * DIM_HEAD]
        v = qkv[:, 2 * INNER + h * DIM_HEAD: 2 * INNER + (h + 1) * DIM_HEAD]
        q = q.reshape(Bb, N, DIM_HEAD)
        k = k.reshape(Bb, N, DIM_HEAD)
        v = v.reshape(Bb, N, DIM_HEAD)

        # F.normalize(_, dim=-1) == x * rsqrt(max(sum(x*x), eps^2)); the
        # per-head logit scale (precomputed in the wrapper) is folded into q.
        q_inv = jax.lax.rsqrt(jnp.maximum(jnp.sum(q * q, -1, keepdims=True),
                                          NORM_EPS * NORM_EPS))
        k_inv = jax.lax.rsqrt(jnp.maximum(jnp.sum(k * k, -1, keepdims=True),
                                          NORM_EPS * NORM_EPS))
        qn = (q * (q_inv * scale_ref[h])).astype(compute_dtype)
        kn = (k * k_inv).astype(compute_dtype)
        vc = v.astype(compute_dtype)

        # ---- flash-style online softmax over KV tiles (f32 statistics) ----
        m_i = jnp.full((Bb, N, 1), -jnp.inf, jnp.float32)
        l_i = jnp.zeros((Bb, N, 1), jnp.float32)
        acc = jnp.zeros((Bb, N, DIM_HEAD), jnp.float32)
        for t in range(n_kv_tiles):
            lo = t * kv_tile
            hi = min(N, lo + kv_tile)
            # cosine-similarity logits (already scaled): (Bb, N, tile), f32 acc
            s = jnp.einsum('bqd,bkd->bqk', qn, kn[:, lo:hi, :],
                           preferred_element_type=jnp.float32)
            m_new = jnp.maximum(m_i, jnp.max(s, -1, keepdims=True))
            alpha = jnp.exp(m_i - m_new)
            p = jnp.exp(s - m_new)
            l_i = alpha * l_i + jnp.sum(p, -1, keepdims=True)
            acc = alpha * acc + jnp.einsum('bqk,bkd->bqd',
                                           p.astype(compute_dtype), vc[:, lo:hi, :],
                                           preferred_element_type=jnp.float32)
            m_i = m_new

        hv = acc * pl.reciprocal(l_i, approx=True)   # (Bb, N, Dh) f32
        head_outs.append(hv.reshape(M, DIM_HEAD))

    # ---- to_out: single K=256 GEMM (full MXU contraction depth) ----
    hv_all = jnp.concatenate(head_outs, axis=-1)     # (M, INNER)
    out = jnp.dot(hv_all.astype(compute_dtype), wout_ref[...],
                  preferred_element_type=jnp.float32)   # (M, C) f32

    # ---- LayerNorm(d_model), eps=1e-5, biased variance (all f32) ----
    mean = jnp.mean(out, -1, keepdims=True)
    cen = out - mean
    var = jnp.mean(cen * cen, -1, keepdims=True)
    ln = cen * jax.lax.rsqrt(var + LN_EPS) * gamma_ref[...] + beta_ref[...]

    # ---- residual + exact (erf) GELU ----
    y = xf + ln
    gelu = 0.5 * y * (1.0 + _erf(y * INV_SQRT2))
    o_ref[...] = gelu.reshape(Bb, N, C).astype(o_ref.dtype)


def _estimate_vmem_bytes(bb, N, C, kv_tile, compute_dtype):
    """Rough per-grid-step working-set estimate (f32 activations)."""
    wb = jnp.dtype(compute_dtype).itemsize
    M = bb * N
    kv = min(N, kv_tile)
    return int(
        2 * 2 * M * C * 4                      # x / out blocks, double-buffered
        + M * 3 * INNER * 4                    # qkv activations
        + 4 * bb * N * kv * 4                  # one head's logits / exp tile temporaries
        + 5 * M * DIM_HEAD * 4                 # per-head q/k/v slices + flash acc
        + HEADS * M * DIM_HEAD * 4             # staged per-head outputs (pre-concat)
        + 3 * M * C * 4                        # concat / to_out / epilogue temps
        + 2 * 4 * INNER * C * wb               # weights (qkv + out), double-buffered
    )


def transformer_encoder_layer(x, params, *, compute_dtype=jnp.bfloat16,
                              batch_block=None, kv_tile=None):
    B, N, C = x.shape
    assert C == D_MODEL and INNER == C

    # ---- generation-aware VMEM budget (v7x: 64 MiB/TC, v5e/v6e: 128 MiB) ----
    try:
        vmem_cap = int(pltpu.get_tpu_info().vmem_capacity_bytes)
    except Exception:
        vmem_cap = 64 * 2**20                  # conservative default
    small_vmem = vmem_cap <= 64 * 2**20        # v7x-like: leave real headroom
    vmem_budget = int(vmem_cap * (0.75 if small_vmem else 0.85))
    row_target = 256 if small_vmem else 512    # target M = Bb*N rows per grid step

    if kv_tile is None:
        kv_tile = min(N, 256 if small_vmem else 512)
        if kv_tile < N:
            kv_tile = max(128, (kv_tile // 128) * 128)   # lane-friendly tile
    kv_tile = max(1, min(kv_tile, N))

    if batch_block is None:
        # Largest Bb that (a) keeps >=2 grid steps when B allows (pipelining +
        # both v7x TensorCores), (b) stays near the row target, (c) fits VMEM.
        batch_block = 1
        for bb in range(1, B + 1):
            if B % bb:
                continue
            if B >= 2 and B // bb < 2:
                continue
            if bb > 1 and bb * N > row_target:
                continue
            if _estimate_vmem_bytes(bb, N, C, kv_tile, compute_dtype) > vmem_budget:
                continue
            batch_block = bb
    Bb = batch_block
    assert B % Bb == 0
    grid = (B // Bb,)

    # Precompute exp(clamp(logit_scale, max=log 100)) once on the host side;
    # weights are pre-cast to the MXU compute dtype (halves their DMA bytes).
    scale = jnp.exp(jnp.minimum(params["logit_scale"],
                                jnp.log(100.0))).astype(jnp.float32)      # (HEADS,)
    wqkv = params["wqkv"].astype(compute_dtype)                           # (C, 3*INNER)
    wout = params["wout"].astype(compute_dtype)                           # (INNER, C)
    bqkv = params["bqkv"].astype(jnp.float32)                             # (1, 3*INNER)
    gamma = params["gamma"].astype(jnp.float32)                           # (1, C)
    beta = params["beta"].astype(jnp.float32)                             # (1, C)

    est = _estimate_vmem_bytes(Bb, N, C, kv_tile, compute_dtype)
    vmem_limit = int(min(max(2 * est, 32 * 2**20), vmem_budget))

    kernel = functools.partial(_encoder_layer_kernel,
                               compute_dtype=compute_dtype, kv_tile=kv_tile)

    return pl.pallas_call(
        kernel,
        out_shape=jax.ShapeDtypeStruct((B, N, C), x.dtype),
        grid_spec=pltpu.PrefetchScalarGridSpec(
            num_scalar_prefetch=0,
            grid=grid,
            in_specs=[
                pl.BlockSpec(memory_space=pltpu.MemorySpace.SMEM),        # scale (HEADS,)
                pl.BlockSpec((Bb, N, C), lambda b: (b, 0, 0)),            # x
                pl.BlockSpec((C, 3 * INNER), lambda b: (0, 0)),           # wqkv
                pl.BlockSpec((1, 3 * INNER), lambda b: (0, 0)),           # bqkv
                pl.BlockSpec((INNER, C), lambda b: (0, 0)),               # wout
                pl.BlockSpec((1, C), lambda b: (0, 0)),                   # gamma
                pl.BlockSpec((1, C), lambda b: (0, 0)),                   # beta
            ],
            out_specs=pl.BlockSpec((Bb, N, C), lambda b: (b, 0, 0)),
        ),
        compiler_params=pltpu.CompilerParams(
            dimension_semantics=("parallel",),
            vmem_limit_bytes=vmem_limit),
    )(scale, x, wqkv, bqkv, wout, gamma, beta)


def reference(x, params):
    # Pure-JAX (f32) reference reproducing the PyTorch forward exactly.
    B, N, C = x.shape
    qkv = x @ params["wqkv"] + params["bqkv"][0]                  # (B, N, 3*INNER)
    qkv = qkv.reshape(B, N, 3, HEADS, DIM_HEAD).transpose(2, 0, 3, 1, 4)
    q, k, v = qkv[0], qkv[1], qkv[2]                              # (B, H, N, Dh)
    qn = q / jnp.maximum(jnp.linalg.norm(q, axis=-1, keepdims=True), NORM_EPS)
    kn = k / jnp.maximum(jnp.linalg.norm(k, axis=-1, keepdims=True), NORM_EPS)
    attn = qn @ jnp.swapaxes(kn, -2, -1)
    scale = jnp.exp(jnp.minimum(params["logit_scale"], jnp.log(100.0)))[None, :, None, None]
    attn = jax.nn.softmax(attn * scale, axis=-1)
    out = (attn @ v).transpose(0, 2, 1, 3).reshape(B, N, C)
    out = out @ params["wout"]
    mean = out.mean(-1, keepdims=True)
    var = ((out - mean) ** 2).mean(-1, keepdims=True)
    ln = (out - mean) / jnp.sqrt(var + LN_EPS) * params["gamma"][0] + params["beta"][0]
    return jax.nn.gelu(x + ln, approximate=False)


def init_params(key):
    k1, k2, k3 = jax.random.split(key, 3)
    return {
        "logit_scale": jnp.full((HEADS,), jnp.log(10.0), jnp.float32),
        "wqkv": (jax.random.normal(k1, (D_MODEL, 3 * INNER), jnp.float32)
                 * (1.0 / jnp.sqrt(D_MODEL))),
        "bqkv": jax.random.normal(k2, (1, 3 * INNER), jnp.float32) * 0.02,
        "wout": (jax.random.normal(k3, (INNER, D_MODEL), jnp.float32)
                 * (1.0 / jnp.sqrt(INNER))),
        "gamma": jnp.ones((1, D_MODEL), jnp.float32),
        "beta": jnp.zeros((1, D_MODEL), jnp.float32),
    }


if __name__ == "__main__":
    key = jax.random.PRNGKey(0)
    kx, kx2, kp = jax.random.split(key, 3)
    params = init_params(kp)

    # --- small shape: single KV tile, both f32 and bf16 compute modes ---
    B, N = 2, 8
    x = jax.random.normal(kx, (B, N, D_MODEL), jnp.float32)
    ref = reference(x, params)

    out_f32 = jax.block_until_ready(
        transformer_encoder_layer(x, params, compute_dtype=jnp.float32))
    assert out_f32.shape == (B, N, D_MODEL)
    assert jnp.allclose(out_f32, ref, atol=5e-3, rtol=5e-3), (
        f"f32-mode mismatch, max err {float(jnp.max(jnp.abs(out_f32 - ref)))}")

    out_bf16 = jax.block_until_ready(
        transformer_encoder_layer(x, params, compute_dtype=jnp.bfloat16))
    assert out_bf16.shape == (B, N, D_MODEL)
    assert jnp.allclose(out_bf16, ref, atol=5e-2, rtol=5e-2), (
        f"bf16-mode mismatch, max err {float(jnp.max(jnp.abs(out_bf16 - ref)))}")

    # --- exercise the multi-tile online-softmax path (kv_tile < N) ---
    B2, N2 = 2, 16
    x2 = jax.random.normal(kx2, (B2, N2, D_MODEL), jnp.float32)
    ref2 = reference(x2, params)
    out_tiled = jax.block_until_ready(
        transformer_encoder_layer(x2, params, compute_dtype=jnp.float32, kv_tile=8))
    assert out_tiled.shape == (B2, N2, D_MODEL)
    assert jnp.allclose(out_tiled, ref2, atol=5e-3, rtol=5e-3), (
        f"tiled-softmax mismatch, max err {float(jnp.max(jnp.abs(out_tiled - ref2)))}")

    print("KERNEL_OK")
</pallas_src>

<mosaic_0001>
module attributes {stable_mosaic.version = 11 : i64} {
  func.func @_encoder_layer_kernel(%arg0: i32, %arg1: memref<4xf32, #tpu.memory_space<smem>>, %arg2: memref<1x8x256xf32, #tpu.memory_space<vmem>>, %arg3: memref<256x768xf32, #tpu.memory_space<vmem>>, %arg4: memref<1x768xf32, #tpu.memory_space<vmem>>, %arg5: memref<256x256xf32, #tpu.memory_space<vmem>>, %arg6: memref<1x256xf32, #tpu.memory_space<vmem>>, %arg7: memref<1x256xf32, #tpu.memory_space<vmem>>, %arg8: memref<1x8x256xf32, #tpu.memory_space<vmem>>) attributes {dimension_semantics = [#tpu.dimension_semantics<parallel>], iteration_bounds = array<i64: 2>, scalar_prefetch = 0 : i64, scratch_operands = 0 : i64, tpu.core_type = #tpu.core_type<tc>, window_params = [{transform_indices = @transform_0, window_bounds = array<i64: 4>}, {transform_indices = @transform_1, window_bounds = array<i64: 1, 8, 256>}, {pipeline_mode = #tpu.pipeline_mode<synchronous>, transform_indices = @transform_2, window_bounds = array<i64: 256, 768>}, {pipeline_mode = #tpu.pipeline_mode<synchronous>, transform_indices = @transform_3, window_bounds = array<i64: 1, 768>}, {pipeline_mode = #tpu.pipeline_mode<synchronous>, transform_indices = @transform_4, window_bounds = array<i64: 256, 256>}, {pipeline_mode = #tpu.pipeline_mode<synchronous>, transform_indices = @transform_5, window_bounds = array<i64: 1, 256>}, {pipeline_mode = #tpu.pipeline_mode<synchronous>, transform_indices = @transform_6, window_bounds = array<i64: 1, 256>}, {transform_indices = @transform_7, window_bounds = array<i64: 1, 8, 256>}]} {
    %c0 = arith.constant 0 : index
    %c0_0 = arith.constant 0 : index
    %c0_1 = arith.constant 0 : index
    %0 = vector.load %arg2[%c0, %c0_0, %c0_1] : memref<1x8x256xf32, #tpu.memory_space<vmem>>, vector<1x8x256xf32>
    %1 = vector.shape_cast %0 : vector<1x8x256xf32> to vector<8x256xf32>
    %c0_2 = arith.constant 0 : index
    %c0_3 = arith.constant 0 : index
    %2 = vector.load %arg3[%c0_2, %c0_3] : memref<256x768xf32, #tpu.memory_space<vmem>>, vector<256x768xf32>
    %cst = arith.constant dense<0.000000e+00> : vector<8x768xf32>
    %3 = tpu.matmul %1, %2, %cst {dimension_numbers = #tpu.dot_dimension_numbers<[1], [0], [0], [1], [0, 0, 1, 1], [], []>} : vector<8x256xf32>, vector<256x768xf32>, vector<8x768xf32> -> vector<8x768xf32>
    %c0_4 = arith.constant 0 : index
    %c0_5 = arith.constant 0 : index
    %4 = vector.load %arg4[%c0_4, %c0_5] : memref<1x768xf32, #tpu.memory_space<vmem>>, vector<1x768xf32>
    %5 = vector.broadcast %4 : vector<1x768xf32> to vector<8x768xf32>
    %6 = arith.addf %3, %5 : vector<8x768xf32>
    %7 = vector.extract_strided_slice %6 {offsets = [0, 0], sizes = [8, 64], strides = [1, 1]} : vector<8x768xf32> to vector<8x64xf32>
    %8 = vector.extract_strided_slice %6 {offsets = [0, 256], sizes = [8, 64], strides = [1, 1]} : vector<8x768xf32> to vector<8x64xf32>
    %9 = vector.extract_strided_slice %6 {offsets = [0, 512], sizes = [8, 64], strides = [1, 1]} : vector<8x768xf32> to vector<8x64xf32>
    %10 = vector.shape_cast %7 : vector<8x64xf32> to vector<1x8x64xf32>
    %11 = vector.shape_cast %8 : vector<8x64xf32> to vector<1x8x64xf32>
    %12 = vector.shape_cast %9 : vector<8x64xf32> to vector<1x8x64xf32>
    %13 = arith.mulf %10, %10 : vector<1x8x64xf32>
    %cst_6 = arith.constant dense<0.000000e+00> : vector<1x8xf32>
    %14 = vector.multi_reduction <add>, %13, %cst_6 [2] : vector<1x8x64xf32> to vector<1x8xf32>
    %15 = vector.shape_cast %14 : vector<1x8xf32> to vector<1x8x1xf32>
    %cst_7 = arith.constant 1.000000e-24 : f32
    %16 = vector.broadcast %cst_7 : f32 to vector<1x8x1xf32>
    %17 = arith.maximumf %15, %16 : vector<1x8x1xf32>
    %18 = math.rsqrt %17 : vector<1x8x1xf32>
    %19 = arith.mulf %11, %11 : vector<1x8x64xf32>
    %cst_8 = arith.constant dense<0.000000e+00> : vector<1x8xf32>
    %20 = vector.multi_reduction <add>, %19, %cst_8 [2] : vector<1x8x64xf32> to vector<1x8xf32>
    %21 = vector.shape_cast %20 : vector<1x8xf32> to vector<1x8x1xf32>
    %cst_9 = arith.constant 1.000000e-24 : f32
    %22 = vector.broadcast %cst_9 : f32 to vector<1x8x1xf32>
    %23 = arith.maximumf %21, %22 : vector<1x8x1xf32>
    %24 = math.rsqrt %23 : vector<1x8x1xf32>
    %c0_10 = arith.constant 0 : index
    %25 = memref.load %arg1[%c0_10] : memref<4xf32, #tpu.memory_space<smem>>
    %26 = vector.broadcast %25 : f32 to vector<1x8x1xf32>
    %27 = arith.mulf %18, %26 : vector<1x8x1xf32>
    %28 = vector.broadcast %27 : vector<1x8x1xf32> to vector<1x8x64xf32>
    %29 = arith.mulf %10, %28 : vector<1x8x64xf32>
    %30 = vector.broadcast %24 : vector<1x8x1xf32> to vector<1x8x64xf32>
    %31 = arith.mulf %11, %30 : vector<1x8x64xf32>
    %cst_11 = arith.constant 0xFF800000 : f32
    %32 = vector.broadcast %cst_11 : f32 to vector<1x8x1xf32>
    %cst_12 = arith.constant 0.000000e+00 : f32
    %33 = vector.broadcast %cst_12 : f32 to vector<1x8x1xf32>
    %cst_13 = arith.constant 0.000000e+00 : f32
    %34 = vector.broadcast %cst_13 : f32 to vector<1x8x64xf32>
    "tpu.trace_start"() <{level = 10 : i32, message = "bqd,bkd->bqk"}> : () -> ()
    %cst_14 = arith.constant dense<0.000000e+00> : vector<1x8x8xf32>
    %35 = tpu.matmul %29, %31, %cst_14 {dimension_numbers = #tpu.dot_dimension_numbers<[2], [2], [1], [1], [0, 0, 0, 1, 1, 1], [0], [0]>} : vector<1x8x64xf32>, vector<1x8x64xf32>, vector<1x8x8xf32> -> vector<1x8x8xf32>
    "tpu.trace_stop"() : () -> ()
    %cst_15 = arith.constant dense<0xFF800000> : vector<1x8xf32>
    %36 = vector.multi_reduction <maximumf>, %35, %cst_15 [2] : vector<1x8x8xf32> to vector<1x8xf32>
    %37 = vector.shape_cast %36 : vector<1x8xf32> to vector<1x8x1xf32>
    %38 = arith.maximumf %32, %37 : vector<1x8x1xf32>
    %39 = arith.subf %32, %38 : vector<1x8x1xf32>
    %40 = math.exp %39 : vector<1x8x1xf32>
    %41 = vector.broadcast %38 : vector<1x8x1xf32> to vector<1x8x8xf32>
    %42 = arith.subf %35, %41 : vector<1x8x8xf32>
    %43 = math.exp %42 : vector<1x8x8xf32>
    %44 = arith.mulf %40, %33 : vector<1x8x1xf32>
    %cst_16 = arith.constant dense<0.000000e+00> : vector<1x8xf32>
    %45 = vector.multi_reduction <add>, %43, %cst_16 [2] : vector<1x8x8xf32> to vector<1x8xf32>
    %46 = vector.shape_cast %45 : vector<1x8xf32> to vector<1x8x1xf32>
    %47 = arith.addf %44, %46 : vector<1x8x1xf32>
    %48 = vector.broadcast %40 : vector<1x8x1xf32> to vector<1x8x64xf32>
    %49 = arith.mulf %48, %34 : vector<1x8x64xf32>
    "tpu.trace_start"() <{level = 10 : i32, message = "bqk,bkd->bqd"}> : () -> ()
    %cst_17 = arith.constant dense<0.000000e+00> : vector<1x8x64xf32>
    %50 = tpu.matmul %43, %12, %cst_17 {dimension_numbers = #tpu.dot_dimension_numbers<[2], [1], [1], [2], [0, 0, 0, 1, 1, 2], [0], [0]>} : vector<1x8x8xf32>, vector<1x8x64xf32>, vector<1x8x64xf32> -> vector<1x8x64xf32>
    "tpu.trace_stop"() : () -> ()
    %51 = arith.addf %49, %50 : vector<1x8x64xf32>
    %52 = tpu.reciprocal %47 {approx = true} : vector<1x8x1xf32> -> vector<1x8x1xf32>
    %53 = vector.broadcast %52 : vector<1x8x1xf32> to vector<1x8x64xf32>
    %54 = arith.mulf %51, %53 : vector<1x8x64xf32>
    %55 = vector.shape_cast %54 : vector<1x8x64xf32> to vector<8x64xf32>
    %56 = vector.extract_strided_slice %6 {offsets = [0, 64], sizes = [8, 64], strides = [1, 1]} : vector<8x768xf32> to vector<8x64xf32>
    %57 = vector.extract_strided_slice %6 {offsets = [0, 320], sizes = [8, 64], strides = [1, 1]} : vector<8x768xf32> to vector<8x64xf32>
    %58 = vector.extract_strided_slice %6 {offsets = [0, 576], sizes = [8, 64], strides = [1, 1]} : vector<8x768xf32> to vector<8x64xf32>
    %59 = vector.shape_cast %56 : vector<8x64xf32> to vector<1x8x64xf32>
    %60 = vector.shape_cast %57 : vector<8x64xf32> to vector<1x8x64xf32>
    %61 = vector.shape_cast %58 : vector<8x64xf32> to vector<1x8x64xf32>
    %62 = arith.mulf %59, %59 : vector<1x8x64xf32>
    %cst_18 = arith.constant dense<0.000000e+00> : vector<1x8xf32>
    %63 = vector.multi_reduction <add>, %62, %cst_18 [2] : vector<1x8x64xf32> to vector<1x8xf32>
    %64 = vector.shape_cast %63 : vector<1x8xf32> to vector<1x8x1xf32>
    %cst_19 = arith.constant 1.000000e-24 : f32
    %65 = vector.broadcast %cst_19 : f32 to vector<1x8x1xf32>
    %66 = arith.maximumf %64, %65 : vector<1x8x1xf32>
    %67 = math.rsqrt %66 : vector<1x8x1xf32>
    %68 = arith.mulf %60, %60 : vector<1x8x64xf32>
    %cst_20 = arith.constant dense<0.000000e+00> : vector<1x8xf32>
    %69 = vector.multi_reduction <add>, %68, %cst_20 [2] : vector<1x8x64xf32> to vector<1x8xf32>
    %70 = vector.shape_cast %69 : vector<1x8xf32> to vector<1x8x1xf32>
    %cst_21 = arith.constant 1.000000e-24 : f32
    %71 = vector.broadcast %cst_21 : f32 to vector<1x8x1xf32>
    %72 = arith.maximumf %70, %71 : vector<1x8x1xf32>
    %73 = math.rsqrt %72 : vector<1x8x1xf32>
    %c1 = arith.constant 1 : index
    %74 = memref.load %arg1[%c1] : memref<4xf32, #tpu.memory_space<smem>>
    %75 = vector.broadcast %74 : f32 to vector<1x8x1xf32>
    %76 = arith.mulf %67, %75 : vector<1x8x1xf32>
    %77 = vector.broadcast %76 : vector<1x8x1xf32> to vector<1x8x64xf32>
    %78 = arith.mulf %59, %77 : vector<1x8x64xf32>
    %79 = vector.broadcast %73 : vector<1x8x1xf32> to vector<1x8x64xf32>
    %80 = arith.mulf %60, %79 : vector<1x8x64xf32>
    %cst_22 = arith.constant 0xFF800000 : f32
    %81 = vector.broadcast %cst_22 : f32 to vector<1x8x1xf32>
    %cst_23 = arith.constant 0.000000e+00 : f32
    %82 = vector.broadcast %cst_23 : f32 to vector<1x8x1xf32>
    %cst_24 = arith.constant 0.000000e+00 : f32
    %83 = vector.broadcast %cst_24 : f32 to vector<1x8x64xf32>
    "tpu.trace_start"() <{level = 10 : i32, message = "bqd,bkd->bqk"}> : () -> ()
    %cst_25 = arith.constant dense<0.000000e+00> : vector<1x8x8xf32>
    %84 = tpu.matmul %78, %80, %cst_25 {dimension_numbers = #tpu.dot_dimension_numbers<[2], [2], [1], [1], [0, 0, 0, 1, 1, 1], [0], [0]>} : vector<1x8x64xf32>, vector<1x8x64xf32>, vector<1x8x8xf32> -> vector<1x8x8xf32>
    "tpu.trace_stop"() : () -> ()
    %cst_26 = arith.constant dense<0xFF800000> : vector<1x8xf32>
    %85 = vector.multi_reduction <maximumf>, %84, %cst_26 [2] : vector<1x8x8xf32> to vector<1x8xf32>
    %86 = vector.shape_cast %85 : vector<1x8xf32> to vector<1x8x1xf32>
    %87 = arith.maximumf %81, %86 : vector<1x8x1xf32>
    %88 = arith.subf %81, %87 : vector<1x8x1xf32>
    %89 = math.exp %88 : vector<1x8x1xf32>
    %90 = vector.broadcast %87 : vector<1x8x1xf32> to vector<1x8x8xf32>
    %91 = arith.subf %84, %90 : vector<1x8x8xf32>
    %92 = math.exp %91 : vector<1x8x8xf32>
    %93 = arith.mulf %89, %82 : vector<1x8x1xf32>
    %cst_27 = arith.constant dense<0.000000e+00> : vector<1x8xf32>
    %94 = vector.multi_reduction <add>, %92, %cst_27 [2] : vector<1x8x8xf32> to vector<1x8xf32>
    %95 = vector.shape_cast %94 : vector<1x8xf32> to vector<1x8x1xf32>
    %96 = arith.addf %93, %95 : vector<1x8x1xf32>
    %97 = vector.broadcast %89 : vector<1x8x1xf32> to vector<1x8x64xf32>
    %98 = arith.mulf %97, %83 : vector<1x8x64xf32>
    "tpu.trace_start"() <{level = 10 : i32, message = "bqk,bkd->bqd"}> : () -> ()
    %cst_28 = arith.constant dense<0.000000e+00> : vector<1x8x64xf32>
    %99 = tpu.matmul %92, %61, %cst_28 {dimension_numbers = #tpu.dot_dimension_numbers<[2], [1], [1], [2], [0, 0, 0, 1, 1, 2], [0], [0]>} : vector<1x8x8xf32>, vector<1x8x64xf32>, vector<1x8x64xf32> -> vector<1x8x64xf32>
    "tpu.trace_stop"() : () -> ()
    %100 = arith.addf %98, %99 : vector<1x8x64xf32>
    %101 = tpu.reciprocal %96 {approx = true} : vector<1x8x1xf32> -> vector<1x8x1xf32>
    %102 = vector.broadcast %101 : vector<1x8x1xf32> to vector<1x8x64xf32>
    %103 = arith.mulf %100, %102 : vector<1x8x64xf32>
    %104 = vector.shape_cast %103 : vector<1x8x64xf32> to vector<8x64xf32>
    %105 = vector.extract_strided_slice %6 {offsets = [0, 128], sizes = [8, 64], strides = [1, 1]} : vector<8x768xf32> to vector<8x64xf32>
    %106 = vector.extract_strided_slice %6 {offsets = [0, 384], sizes = [8, 64], strides = [1, 1]} : vector<8x768xf32> to vector<8x64xf32>
    %107 = vector.extract_strided_slice %6 {offsets = [0, 640], sizes = [8, 64], strides = [1, 1]} : vector<8x768xf32> to vector<8x64xf32>
    %108 = vector.shape_cast %105 : vector<8x64xf32> to vector<1x8x64xf32>
    %109 = vector.shape_cast %106 : vector<8x64xf32> to vector<1x8x64xf32>
    %110 = vector.shape_cast %107 : vector<8x64xf32> to vector<1x8x64xf32>
    %111 = arith.mulf %108, %108 : vector<1x8x64xf32>
    %cst_29 = arith.constant dense<0.000000e+00> : vector<1x8xf32>
    %112 = vector.multi_reduction <add>, %111, %cst_29 [2] : vector<1x8x64xf32> to vector<1x8xf32>
    %113 = vector.shape_cast %112 : vector<1x8xf32> to vector<1x8x1xf32>
    %cst_30 = arith.constant 1.000000e-24 : f32
    %114 = vector.broadcast %cst_30 : f32 to vector<1x8x1xf32>
    %115 = arith.maximumf %113, %114 : vector<1x8x1xf32>
    %116 = math.rsqrt %115 : vector<1x8x1xf32>
    %117 = arith.mulf %109, %109 : vector<1x8x64xf32>
    %cst_31 = arith.constant dense<0.000000e+00> : vector<1x8xf32>
    %118 = vector.multi_reduction <add>, %117, %cst_31 [2] : vector<1x8x64xf32> to vector<1x8xf32>
    %119 = vector.shape_cast %118 : vector<1x8xf32> to vector<1x8x1xf32>
    %cst_32 = arith.constant 1.000000e-24 : f32
    %120 = vector.broadcast %cst_32 : f32 to vector<1x8x1xf32>
    %121 = arith.maximumf %119, %120 : vector<1x8x1xf32>
    %122 = math.rsqrt %121 : vector<1x8x1xf32>
    %c2 = arith.constant 2 : index
    %123 = memref.load %arg1[%c2] : memref<4xf32, #tpu.memory_space<smem>>
    %124 = vector.broadcast %123 : f32 to vector<1x8x1xf32>
    %125 = arith.mulf %116, %124 : vector<1x8x1xf32>
    %126 = vector.broadcast %125 : vector<1x8x1xf32> to vector<1x8x64xf32>
    %127 = arith.mulf %108, %126 : vector<1x8x64xf32>
    %128 = vector.broadcast %122 : vector<1x8x1xf32> to vector<1x8x64xf32>
    %129 = arith.mulf %109, %128 : vector<1x8x64xf32>
    %cst_33 = arith.constant 0xFF800000 : f32
    %130 = vector.broadcast %cst_33 : f32 to vector<1x8x1xf32>
    %cst_34 = arith.constant 0.000000e+00 : f32
    %131 = vector.broadcast %cst_34 : f32 to vector<1x8x1xf32>
    %cst_35 = arith.constant 0.000000e+00 : f32
    %132 = vector.broadcast %cst_35 : f32 to vector<1x8x64xf32>
    "tpu.trace_start"() <{level = 10 : i32, message = "bqd,bkd->bqk"}> : () -> ()
    %cst_36 = arith.constant dense<0.000000e+00> : vector<1x8x8xf32>
    %133 = tpu.matmul %127, %129, %cst_36 {dimension_numbers = #tpu.dot_dimension_numbers<[2], [2], [1], [1], [0, 0, 0, 1, 1, 1], [0], [0]>} : vector<1x8x64xf32>, vector<1x8x64xf32>, vector<1x8x8xf32> -> vector<1x8x8xf32>
    "tpu.trace_stop"() : () -> ()
    %cst_37 = arith.constant dense<0xFF800000> : vector<1x8xf32>
    %134 = vector.multi_reduction <maximumf>, %133, %cst_37 [2] : vector<1x8x8xf32> to vector<1x8xf32>
    %135 = vector.shape_cast %134 : vector<1x8xf32> to vector<1x8x1xf32>
    %136 = arith.maximumf %130, %135 : vector<1x8x1xf32>
    %137 = arith.subf %130, %136 : vector<1x8x1xf32>
    %138 = math.exp %137 : vector<1x8x1xf32>
    %139 = vector.broadcast %136 : vector<1x8x1xf32> to vector<1x8x8xf32>
    %140 = arith.subf %133, %139 : vector<1x8x8xf32>
    %141 = math.exp %140 : vector<1x8x8xf32>
    %142 = arith.mulf %138, %131 : vector<1x8x1xf32>
    %cst_38 = arith.constant dense<0.000000e+00> : vector<1x8xf32>
    %143 = vector.multi_reduction <add>, %141, %cst_38 [2] : vector<1x8x8xf32> to vector<1x8xf32>
    %144 = vector.shape_cast %143 : vector<1x8xf32> to vector<1x8x1xf32>
    %145 = arith.addf %142, %144 : vector<1x8x1xf32>
    %146 = vector.broadcast %138 : vector<1x8x1xf32> to vector<1x8x64xf32>
    %147 = arith.mulf %146, %132 : vector<1x8x64xf32>
    "tpu.trace_start"() <{level = 10 : i32, message = "bqk,bkd->bqd"}> : () -> ()
    %cst_39 = arith.constant dense<0.000000e+00> : vector<1x8x64xf32>
    %148 = tpu.matmul %141, %110, %cst_39 {dimension_numbers = #tpu.dot_dimension_numbers<[2], [1], [1], [2], [0, 0, 0, 1, 1, 2], [0], [0]>} : vector<1x8x8xf32>, vector<1x8x64xf32>, vector<1x8x64xf32> -> vector<1x8x64xf32>
    "tpu.trace_stop"() : () -> ()
    %149 = arith.addf %147, %148 : vector<1x8x64xf32>
    %150 = tpu.reciprocal %145 {approx = true} : vector<1x8x1xf32> -> vector<1x8x1xf32>
    %151 = vector.broadcast %150 : vector<1x8x1xf32> to vector<1x8x64xf32>
    %152 = arith.mulf %149, %151 : vector<1x8x64xf32>
    %153 = vector.shape_cast %152 : vector<1x8x64xf32> to vector<8x64xf32>
    %154 = vector.extract_strided_slice %6 {offsets = [0, 192], sizes = [8, 64], strides = [1, 1]} : vector<8x768xf32> to vector<8x64xf32>
    %155 = vector.extract_strided_slice %6 {offsets = [0, 448], sizes = [8, 64], strides = [1, 1]} : vector<8x768xf32> to vector<8x64xf32>
    %156 = vector.extract_strided_slice %6 {offsets = [0, 704], sizes = [8, 64], strides = [1, 1]} : vector<8x768xf32> to vector<8x64xf32>
    %157 = vector.shape_cast %154 : vector<8x64xf32> to vector<1x8x64xf32>
    %158 = vector.shape_cast %155 : vector<8x64xf32> to vector<1x8x64xf32>
    %159 = vector.shape_cast %156 : vector<8x64xf32> to vector<1x8x64xf32>
    %160 = arith.mulf %157, %157 : vector<1x8x64xf32>
    %cst_40 = arith.constant dense<0.000000e+00> : vector<1x8xf32>
    %161 = vector.multi_reduction <add>, %160, %cst_40 [2] : vector<1x8x64xf32> to vector<1x8xf32>
    %162 = vector.shape_cast %161 : vector<1x8xf32> to vector<1x8x1xf32>
    %cst_41 = arith.constant 1.000000e-24 : f32
    %163 = vector.broadcast %cst_41 : f32 to vector<1x8x1xf32>
    %164 = arith.maximumf %162, %163 : vector<1x8x1xf32>
    %165 = math.rsqrt %164 : vector<1x8x1xf32>
    %166 = arith.mulf %158, %158 : vector<1x8x64xf32>
    %cst_42 = arith.constant dense<0.000000e+00> : vector<1x8xf32>
    %167 = vector.multi_reduction <add>, %166, %cst_42 [2] : vector<1x8x64xf32> to vector<1x8xf32>
    %168 = vector.shape_cast %167 : vector<1x8xf32> to vector<1x8x1xf32>
    %cst_43 = arith.constant 1.000000e-24 : f32
    %169 = vector.broadcast %cst_43 : f32 to vector<1x8x1xf32>
    %170 = arith.maximumf %168, %169 : vector<1x8x1xf32>
    %171 = math.rsqrt %170 : vector<1x8x1xf32>
    %c3 = arith.constant 3 : index
    %172 = memref.load %arg1[%c3] : memref<4xf32, #tpu.memory_space<smem>>
    %173 = vector.broadcast %172 : f32 to vector<1x8x1xf32>
    %174 = arith.mulf %165, %173 : vector<1x8x1xf32>
    %175 = vector.broadcast %174 : vector<1x8x1xf32> to vector<1x8x64xf32>
    %176 = arith.mulf %157, %175 : vector<1x8x64xf32>
    %177 = vector.broadcast %171 : vector<1x8x1xf32> to vector<1x8x64xf32>
    %178 = arith.mulf %158, %177 : vector<1x8x64xf32>
    %cst_44 = arith.constant 0xFF800000 : f32
    %179 = vector.broadcast %cst_44 : f32 to vector<1x8x1xf32>
    %cst_45 = arith.constant 0.000000e+00 : f32
    %180 = vector.broadcast %cst_45 : f32 to vector<1x8x1xf32>
    %cst_46 = arith.constant 0.000000e+00 : f32
    %181 = vector.broadcast %cst_46 : f32 to vector<1x8x64xf32>
    "tpu.trace_start"() <{level = 10 : i32, message = "bqd,bkd->bqk"}> : () -> ()
    %cst_47 = arith.constant dense<0.000000e+00> : vector<1x8x8xf32>
    %182 = tpu.matmul %176, %178, %cst_47 {dimension_numbers = #tpu.dot_dimension_numbers<[2], [2], [1], [1], [0, 0, 0, 1, 1, 1], [0], [0]>} : vector<1x8x64xf32>, vector<1x8x64xf32>, vector<1x8x8xf32> -> vector<1x8x8xf32>
    "tpu.trace_stop"() : () -> ()
    %cst_48 = arith.constant dense<0xFF800000> : vector<1x8xf32>
    %183 = vector.multi_reduction <maximumf>, %182, %cst_48 [2] : vector<1x8x8xf32> to vector<1x8xf32>
    %184 = vector.shape_cast %183 : vector<1x8xf32> to vector<1x8x1xf32>
    %185 = arith.maximumf %179, %184 : vector<1x8x1xf32>
    %186 = arith.subf %179, %185 : vector<1x8x1xf32>
    %187 = math.exp %186 : vector<1x8x1xf32>
    %188 = vector.broadcast %185 : vector<1x8x1xf32> to vector<1x8x8xf32>
    %189 = arith.subf %182, %188 : vector<1x8x8xf32>
    %190 = math.exp %189 : vector<1x8x8xf32>
    %191 = arith.mulf %187, %180 : vector<1x8x1xf32>
    %cst_49 = arith.constant dense<0.000000e+00> : vector<1x8xf32>
    %192 = vector.multi_reduction <add>, %190, %cst_49 [2] : vector<1x8x8xf32> to vector<1x8xf32>
    %193 = vector.shape_cast %192 : vector<1x8xf32> to vector<1x8x1xf32>
    %194 = arith.addf %191, %193 : vector<1x8x1xf32>
    %195 = vector.broadcast %187 : vector<1x8x1xf32> to vector<1x8x64xf32>
    %196 = arith.mulf %195, %181 : vector<1x8x64xf32>
    "tpu.trace_start"() <{level = 10 : i32, message = "bqk,bkd->bqd"}> : () -> ()
    %cst_50 = arith.constant dense<0.000000e+00> : vector<1x8x64xf32>
    %197 = tpu.matmul %190, %159, %cst_50 {dimension_numbers = #tpu.dot_dimension_numbers<[2], [1], [1], [2], [0, 0, 0, 1, 1, 2], [0], [0]>} : vector<1x8x8xf32>, vector<1x8x64xf32>, vector<1x8x64xf32> -> vector<1x8x64xf32>
    "tpu.trace_stop"() : () -> ()
    %198 = arith.addf %196, %197 : vector<1x8x64xf32>
    %199 = tpu.reciprocal %194 {approx = true} : vector<1x8x1xf32> -> vector<1x8x1xf32>
    %200 = vector.broadcast %199 : vector<1x8x1xf32> to vector<1x8x64xf32>
    %201 = arith.mulf %198, %200 : vector<1x8x64xf32>
    %202 = vector.shape_cast %201 : vector<1x8x64xf32> to vector<8x64xf32>
    %203 = tpu.concatenate %55, %104, %153, %202 in 1 : vector<8x64xf32>, vector<8x64xf32>, vector<8x64xf32>, vector<8x64xf32> -> vector<8x256xf32>
    %c0_51 = arith.constant 0 : index
    %c0_52 = arith.constant 0 : index
    %204 = vector.load %arg5[%c0_51, %c0_52] : memref<256x256xf32, #tpu.memory_space<vmem>>, vector<256x256xf32>
    %cst_53 = arith.constant dense<0.000000e+00> : vector<8x256xf32>
    %205 = tpu.matmul %203, %204, %cst_53 {dimension_numbers = #tpu.dot_dimension_numbers<[1], [0], [0], [1], [0, 0, 1, 1], [], []>} : vector<8x256xf32>, vector<256x256xf32>, vector<8x256xf32> -> vector<8x256xf32>
    %cst_54 = arith.constant dense<0.000000e+00> : vector<8xf32>
    %206 = vector.multi_reduction <add>, %205, %cst_54 [1] : vector<8x256xf32> to vector<8xf32>
    %207 = vector.shape_cast %206 : vector<8xf32> to vector<8x1xf32>
    %cst_55 = arith.constant 2.560000e+02 : f32
    %208 = vector.broadcast %cst_55 : f32 to vector<8x1xf32>
    %209 = arith.divf %207, %208 : vector<8x1xf32>
    %210 = vector.broadcast %209 : vector<8x1xf32> to vector<8x256xf32>
    %211 = arith.subf %205, %210 : vector<8x256xf32>
    %212 = arith.mulf %211, %211 : vector<8x256xf32>
    %cst_56 = arith.constant dense<0.000000e+00> : vector<8xf32>
    %213 = vector.multi_reduction <add>, %212, %cst_56 [1] : vector<8x256xf32> to vector<8xf32>
    %214 = vector.shape_cast %213 : vector<8xf32> to vector<8x1xf32>
    %cst_57 = arith.constant 2.560000e+02 : f32
    %215 = vector.broadcast %cst_57 : f32 to vector<8x1xf32>
    %216 = arith.divf %214, %215 : vector<8x1xf32>
    %cst_58 = arith.constant 9.99999974E-6 : f32
    %217 = vector.broadcast %cst_58 : f32 to vector<8x1xf32>
    %218 = arith.addf %216, %217 : vector<8x1xf32>
    %219 = math.rsqrt %218 : vector<8x1xf32>
    %220 = vector.broadcast %219 : vector<8x1xf32> to vector<8x256xf32>
    %221 = arith.mulf %211, %220 : vector<8x256xf32>
    %c0_59 = arith.constant 0 : index
    %c0_60 = arith.constant 0 : index
    %222 = vector.load %arg6[%c0_59, %c0_60] : memref<1x256xf32, #tpu.memory_space<vmem>>, vector<1x256xf32>
    %223 = vector.broadcast %222 : vector<1x256xf32> to vector<8x256xf32>
    %224 = arith.mulf %221, %223 : vector<8x256xf32>
    %c0_61 = arith.constant 0 : index
    %c0_62 = arith.constant 0 : index
    %225 = vector.load %arg7[%c0_61, %c0_62] : memref<1x256xf32, #tpu.memory_space<vmem>>, vector<1x256xf32>
    %226 = vector.broadcast %225 : vector<1x256xf32> to vector<8x256xf32>
    %227 = arith.addf %224, %226 : vector<8x256xf32>
    %228 = arith.addf %1, %227 : vector<8x256xf32>
    %cst_63 = arith.constant 5.000000e-01 : f32
    %229 = vector.broadcast %cst_63 : f32 to vector<8x256xf32>
    %230 = arith.mulf %229, %228 : vector<8x256xf32>
    %cst_64 = arith.constant 0.707106769 : f32
    %231 = vector.broadcast %cst_64 : f32 to vector<8x256xf32>
    %232 = arith.mulf %228, %231 : vector<8x256xf32>
    %cst_65 = arith.constant 0.000000e+00 : f32
    %233 = vector.broadcast %cst_65 : f32 to vector<8x256xf32>
    %234 = arith.cmpf oge, %232, %233 : vector<8x256xf32>
    %cst_66 = arith.constant 1.000000e+00 : f32
    %cst_67 = arith.constant -1.000000e+00 : f32
    %235 = vector.broadcast %cst_66 : f32 to vector<8x256xf32>
    %236 = vector.broadcast %cst_67 : f32 to vector<8x256xf32>
    %237 = arith.select %234, %235, %236 : vector<8x256xi1>, vector<8x256xf32>
    %238 = math.absf %232 : vector<8x256xf32>
    %cst_68 = arith.constant 0.327591091 : f32
    %239 = vector.broadcast %cst_68 : f32 to vector<8x256xf32>
    %240 = arith.mulf %239, %238 : vector<8x256xf32>
    %cst_69 = arith.constant 1.000000e+00 : f32
    %241 = vector.broadcast %cst_69 : f32 to vector<8x256xf32>
    %242 = arith.addf %241, %240 : vector<8x256xf32>
    %243 = tpu.reciprocal %242 {approx = true} : vector<8x256xf32> -> vector<8x256xf32>
    %cst_70 = arith.constant 1.06140542 : f32
    %244 = vector.broadcast %cst_70 : f32 to vector<8x256xf32>
    %245 = arith.mulf %244, %243 : vector<8x256xf32>
    %cst_71 = arith.constant -1.45315206 : f32
    %246 = vector.broadcast %cst_71 : f32 to vector<8x256xf32>
    %247 = arith.addf %245, %246 : vector<8x256xf32>
    %248 = arith.mulf %247, %243 : vector<8x256xf32>
    %cst_72 = arith.constant 1.42141378 : f32
    %249 = vector.broadcast %cst_72 : f32 to vector<8x256xf32>
    %250 = arith.addf %248, %249 : vector<8x256xf32>
    %251 = arith.mulf %250, %243 : vector<8x256xf32>
    %cst_73 = arith.constant -0.284496725 : f32
    %252 = vector.broadcast %cst_73 : f32 to vector<8x256xf32>
    %253 = arith.addf %251, %252 : vector<8x256xf32>
    %254 = arith.mulf %253, %243 : vector<8x256xf32>
    %cst_74 = arith.constant 0.254829586 : f32
    %255 = vector.broadcast %cst_74 : f32 to vector<8x256xf32>
    %256 = arith.addf %254, %255 : vector<8x256xf32>
    %257 = arith.mulf %256, %243 : vector<8x256xf32>
    %cst_75 = arith.constant 0.000000e+00 : f32
    %258 = vector.broadcast %cst_75 : f32 to vector<8x256xf32>
    %259 = arith.subf %258, %238 : vector<8x256xf32>
    %260 = arith.mulf %259, %238 : vector<8x256xf32>
    %261 = math.exp %260 : vector<8x256xf32>
    %262 = arith.mulf %257, %261 : vector<8x256xf32>
    %cst_76 = arith.constant 1.000000e+00 : f32
    %263 = vector.broadcast %cst_76 : f32 to vector<8x256xf32>
    %264 = arith.subf %263, %262 : vector<8x256xf32>
    %265 = arith.mulf %237, %264 : vector<8x256xf32>
    %cst_77 = arith.constant 1.000000e+00 : f32
    %266 = vector.broadcast %cst_77 : f32 to vector<8x256xf32>
    %267 = arith.addf %266, %265 : vector<8x256xf32>
    %268 = arith.mulf %230, %267 : vector<8x256xf32>
    %269 = vector.shape_cast %268 : vector<8x256xf32> to vector<1x8x256xf32>
    %c0_78 = arith.constant 0 : index
    %c0_79 = arith.constant 0 : index
    %c0_80 = arith.constant 0 : index
    %270 = vector.load %arg8[%c0_78, %c0_79, %c0_80] : memref<1x8x256xf32, #tpu.memory_space<vmem>>, vector<1x8x256xf32>
    tpu.vector_store %arg8[%c0_78, %c0_79, %c0_80], %269 {strides = array<i32>} : memref<1x8x256xf32, #tpu.memory_space<vmem>>, vector<1x8x256xf32>,
    return
  }
  func.func @transform_0(%arg0: i32) -> i32 {
    %c0_i32 = arith.constant 0 : i32
    %c0_i32_0 = arith.constant 0 : i32
    return %c0_i32 : i32
  }
  func.func @transform_1(%arg0: i32) -> (i32, i32, i32) {
    %c0_i32 = arith.constant 0 : i32
    %c0_i32_0 = arith.constant 0 : i32
    %c0_i32_1 = arith.constant 0 : i32
    return %arg0, %c0_i32, %c0_i32_0 : i32, i32, i32
  }
  func.func @transform_2(%arg0: i32) -> (i32, i32) {
    %c0_i32 = arith.constant 0 : i32
    %c0_i32_0 = arith.constant 0 : i32
    %c0_i32_1 = arith.constant 0 : i32
    return %c0_i32, %c0_i32_0 : i32, i32
  }
  func.func @transform_3(%arg0: i32) -> (i32, i32) {
    %c0_i32 = arith.constant 0 : i32
    %c0_i32_0 = arith.constant 0 : i32
    %c0_i32_1 = arith.constant 0 : i32
    return %c0_i32, %c0_i32_0 : i32, i32
  }
  func.func @transform_4(%arg0: i32) -> (i32, i32) {
    %c0_i32 = arith.constant 0 : i32
    %c0_i32_0 = arith.constant 0 : i32
    %c0_i32_1 = arith.constant 0 : i32
    return %c0_i32, %c0_i32_0 : i32, i32
  }
  func.func @transform_5(%arg0: i32) -> (i32, i32) {
    %c0_i32 = arith.constant 0 : i32
    %c0_i32_0 = arith.constant 0 : i32
    %c0_i32_1 = arith.constant 0 : i32
    return %c0_i32, %c0_i32_0 : i32, i32
  }
  func.func @transform_6(%arg0: i32) -> (i32, i32) {
    %c0_i32 = arith.constant 0 : i32
    %c0_i32_0 = arith.constant 0 : i32
    %c0_i32_1 = arith.constant 0 : i32
    return %c0_i32, %c0_i32_0 : i32, i32
  }
  func.func @transform_7(%arg0: i32) -> (i32, i32, i32) {
    %c0_i32 = arith.constant 0 : i32
    %c0_i32_0 = arith.constant 0 : i32
    %c0_i32_1 = arith.constant 0 : i32
    return %arg0, %c0_i32, %c0_i32_0 : i32, i32, i32
  }
}

</mosaic_0001>

<bundles_post_ra>
// kernel: tpu_custom_call.1
= control target key start
LH: loop header
LB: loop body
LE: loop exit
PB: predicated region body
PF: predicated region fallthrough
CT: control target
= control target key end

     0   :  { %s2420_s0 = inlined_call_operand.hbm [shape: f32[4], index: 0, kind: input, shape index: {}]   ;;  %s2421_s1 = inlined_call_operand.hbm [shape: f32[2,8,256], index: 1, kind: input, shape index: {}]   ;;  %s2422_s2 = inlined_call_operand.hbm [shape: f32[256,768], index: 2, kind: input, shape index: {}]   ;;  %s2423_s3 = inlined_call_operand.hbm [shape: f32[1,768], index: 3, kind: input, shape index: {}]   ;;  %s2424_s4 = inlined_call_operand.hbm [shape: f32[256,256], index: 4, kind: input, shape index: {}]   ;;  %s2425_s5 = inlined_call_operand.vmem [shape: f32[1,256], index: 5, kind: input, shape index: {}]   ;;  %s2426_s6 = inlined_call_operand.vmem [shape: f32[1,256], index: 6, kind: input, shape index: {}]   ;;  %s2427_s7 = inlined_call_operand.hbm [shape: f32[2,8,256], index: 7, kind: output, shape index: {}]  }
   0x1   :  { %2428 = sst [smem:[#allocation18_spill]] %s2420_s0 }
   0x2   :  { %2429 = sst [smem:[#allocation19_spill]] %s2422_s2 }
   0x3   :  { %12 = vsyncpa [#allocation5], 0 }
   0x4   :  { %13 = vsyncpa [#allocation3], 0 }
   0x5   :  { %15 = vsyncpa [#allocation3 + $0x1], 0 }
   0x6   :  { %16 = vsyncpa [#allocation8], 0 }
   0x7   :  { %17 = vsyncpa [#allocation11], 0 }
   0x8   :  { %18 = vsyncpa [#allocation4], 0 }
   0x9   :  { %20 = vsyncpa [#allocation4 + $0x1], 0  ;;  %s2085_s24 = smov 0   ;;  %s2087_s25 = smov 0  }
   0xa   :  { %s2089_s26 = smov 0   ;;  %s2091_s27 = smov 0  }
   0xb LB: > { %s2430_s2 = sld [smem:[#allocation19_spill]]  ;;  %s2109_s8 = sadd.s32 4294967295, %s2032_s27   ;;  %s2032_s27 = sphi %s2091_s27, %s2443_s27   ;;  %s2028_s26 = sphi %s2089_s26, %s2442_s26   ;;  %s2024_s25 = sphi %s2087_s25, %s2441_s25   ;;  %s2020_s24 = sphi %s2085_s24, %s2440_s24  }
   0xc   : > { %p1628_p0 = scmp.ge.s32.totalorder %s2032_s27, 1  ;;  %p68_p1 = scmp.eq.s32.totalorder %s2109_s8, 0 }
   0xd   : > { %p209_p2 = scmp.lt.s32.totalorder %s2032_s27, 3  ;;  %s2034_s10 = smov [#allocation7]  }
   0xe   : > { %s232_s11 = sshll.u32 %s2034_s10, 4  ;;  %s2432_s0 = sld [smem:[#allocation18_spill]]  ;;  %s233_s11 = int_to_ptr.vmem [resolvable:$true] %s232_s11 }
   0xf   : > { %p2114_p3 = pnand %p1628_p0, %p209_p2  ;;  %s245_s18 = sshll.u32 %s2423_s3, 4  ;;  %s246_s18 = int_to_ptr.hbm [resolvable:$true] %s245_s18 }
  0x10   : > { %s2035_s19 = smov 768   ;;  %s2036_s20 = smov 48  }
  0x11   : > { %s230_s30 = sshll.u32 %s2430_s2, 4  ;;  %p1686_p4 = pneg %p2114_p3  ;;  %s231_s30 = int_to_ptr.hbm [resolvable:$true] %s230_s30 }
  0x12   : > { %s2037_s21 = smov [#allocation2]   ;;  %s256_s28 = sshll.u32 %s2424_s4, 4  ;;  %s257_s28 = int_to_ptr.hbm [resolvable:$true] %s256_s28 }
  0x13   : > { %p2126_p6 = pnand %p1686_p4, %p68_p1  ;;  %s2038_s29 = smov [#allocation9]  }
  0x14   : > { %s221_s14 = sshll.u32 %s2432_s0, 4  ;;  %s247_s10 = sshll.u32 %s2038_s29, 4  ;;  %s222_s14 = int_to_ptr.hbm [resolvable:$true] %s221_s14  ;;  %s248_s10 = int_to_ptr.vmem [resolvable:$true] %s247_s10 }
  0x15   : > { %1692 = dma.hbm_to_vmem [thread:$0]  (!%p2126_p6), %s231_s30, 24576, %s233_s11, [#allocation8], %s2035_s19, %s2035_s19, %s2036_s20  }
  0x16   : > { %1689 = dma.hbm_to_smem (!%p2126_p6), %s222_s14, 16, %s2037_s21, [#allocation5]  }
  0x17   : > { %1695 = dma.hbm_to_vmem [thread:$0]  (!%p2126_p6), %s246_s18, 96, %s248_s10, [#allocation8]  }
  0x18   : > { %s2039_s30 = smov [#allocation10]   ;;  %s2040_s12 = smov 256  }
  0x19   : > { %s258_s11 = sshll.u32 %s2039_s30, 4  ;;  %s2041_s13 = smov 16   ;;  %s259_s11 = int_to_ptr.vmem [resolvable:$true] %s258_s11 }
  0x1a   : > { %1698 = dma.hbm_to_vmem [thread:$0]  (!%p2126_p6), %s257_s28, 8192, %s259_s11, [#allocation11], %s2040_s12, %s2040_s12, %s2041_s13  }
  0x1b   : > { %s1627_s14 = sadd.s32 4294967294, %s2032_s27   ;;  %s2146_s16 = sadd.s32 1, %s2032_s27  }
  0x1c   : > { %s51_s17 = ssub.s32 %s2032_s27, %s2146_s16  ;;  %s54_s19 = sadd.s32 1, %s2028_s26 }
  0x1d   : > { %p52_p7 = scmp.eq.s32.totalorder %s51_s17, 0  ;;  %p61_p8 = scmp.ne.s32.totalorder %s2028_s26, %s2024_s25 }
  0x1e   : > { %p62_p9 = scmp.eq.s32.totalorder %s2032_s27, 0  ;;  %p67_p10 = scmp.ne.s32.totalorder %s2024_s25, %s2020_s24 }
  0x1f   : > { %s2157_s18 = scalar_select %p52_p7, %s2028_s26, %s54_s19  }
  0x20   : > { %p2159_p11 = por %p62_p9, %p61_p8  ;;  %p2165_p12 = por %p68_p1, %p67_p10 }
  0x21   : > { %p196_p13 = scmp.eq.s32.totalorder %s2109_s8, 1  ;;  %p202_p0 = scmp.eq.s32.totalorder %s1627_s14, 1 }
  0x22   : > { %p1711_p2 = scmp.lt.s32.totalorder %s2032_s27, 2  ;;  %s278_s21 = sand.u32 1, %s2028_s26  }
  0x23   : > { %p2172_p4 = por %p196_p13, %p61_p8  ;;  %p2176_p6 = por %p202_p0, %p67_p10 }
  0x24   : > { %s1634_s28 = sshll.u32 %s278_s21, 4  ;;  %s1664_s29 = sshll.u32 %s2032_s27, 4 }
  0x25   : > { %s287_s11 = scalar_lea.hbm %s2421_s1, %s1664_s29  ;;  %s282_s12 = scalar_lea.vmem [#allocation6], %s1634_s28 }
  0x26   : > { %s291_s13 = sshll.u32 %s282_s12, 4  ;;  %s289_s17 = sshll.u32 %s287_s11, 4  ;;  %s292_s13 = int_to_ptr.vmem [resolvable:$true] %s291_s13  ;;  %s290_s17 = int_to_ptr.hbm [resolvable:$true] %s289_s17 }
  0x27   : > { %p2186_p7 = pnand %p1711_p2, %p2159_p11  ;;  %s279_s19 = scalar_lea.sflag [#allocation3], %s278_s21 }
  0x28   : > { %s1924_s0 = sshra.s32 %s290_s17, 4  ;;  %s1931_s10 = scalar_lea.hbm %s2421_s1, 32  ;;  %s1925_s0 = int_to_ptr.hbm [resolvable:$true] %s1924_s0 }
  0x29   : > { %s1926_s2 = scalar_lea.hbm %s1925_s0, 16  ;;  %p1928_p9 = pneg %p2186_p7 }
  0x2a   : > { %p1927_p8 = scmp.ne.s32.totalorder %s1925_s0, %s1926_s2  ;;  %p1932_p11 = scmp.lt.s32.totalorder %s1925_s0, %s2421_s1 }
  0x2b   : > { %p1933_p0 = scmp.lt.s32.totalorder %s1931_s10, %s1926_s2 }
  0x2c   : > { %p1929_p10 = pnand %p1928_p9, %p1927_p8 }
  0x2d   : > { %p1934_p2 = por %p1933_p0, %p1932_p11 }
  0x2e   : > { %p1930_p13 = pneg %p1929_p10 }
  0x30   : > { %p1935_p5 = pnand %p1934_p2, %p1930_p13 }
  0x32   : > { %1938 = shalt.err (!%p1935_p5)
}
  0x33   : > { %1702 = dma.hbm_to_vmem [thread:$0]  (!%p2186_p7), %s290_s17, 256, %s292_s13, %s279_s19  }
  0x34   : > { %300 = sbr.rel (%p2114_p3) target bundleno = 1600 (0x640), region = 48 }
  0x39   : > { %1999 = dma.done.wait (%p68_p1), [#allocation5], 16  }
  0x3a   : > { %2001 = vsyncadd (%p68_p1), [#allocation5], 4294967280  ;;  %s2207_s21 = sand.u32 1, %s2024_s25  }
  0x3b   : > { %s1639_s0 = sshll.u32 %s2207_s21, 4  ;;  %s308_s2 = scalar_lea.sflag [#allocation3], %s2207_s21 }
  0x3c   : > { %s2213_s11 = scalar_lea.vmem [#allocation6], %s1639_s0 }
  0x3d   : > { %2003 = dma.done.wait (%p2165_p12), %s308_s2, 256  }
  0x3e   : > { %2005 = vsyncadd (%p2165_p12), %s308_s2, 4294967040 }
  0x3f   : > { %2007 = dma.done.wait (%p68_p1), [#allocation8], 24672  }
  0x40   : > { %2009 = vsyncadd (%p68_p1), [#allocation8], 4294942624 }
  0x41   : > { %2011 = dma.done.wait (%p68_p1), [#allocation11], 8192  }
  0x42   : > { %2013 = vsyncadd (%p68_p1), [#allocation11], 4294959104 }
  0x43   : > { %332 = sfence }
  0x44   : > { %v451_v0 = vld [vmem:[#allocation7 + $0x2d0] sm:$0xff]  ;;  %v452_v1 = vld [vmem:[#allocation7 + $0x2d8] sm:$0xff]  ;;  %v445_v2 = vld [vmem:[#allocation7 + $0x2a0] sm:$0xff]  ;;  %s2042_s9 = smov 64   ;;  %vm808_vm0 = vcmask 523264   ;;  %s2290_s15 = sld [smem:[#allocation2 + $0x1]] }
  0x45   : > { %567 = vmatpush.msra.mxu0 %v451_v0  ;;  %607 = vmatpush.msra.mxu2 %v452_v1  ;;  %v547_v3 = vld [vmem:[#allocation7 + $0x5d0] sm:$0xff]  ;;  %v446_v4 = vld [vmem:[#allocation7 + $0x2a8] sm:$0xff]  ;;  %v548_v5 = vld [vmem:[#allocation7 + $0x5d8] sm:$0xff]  ;;  %s2311_s12 = sld [smem:[#allocation2]]  ;;  %s1665_s10 = sshll.u32 %s2109_s8, 4 }
  0x46   : > { %587 = vmatpush.msra.mxu1 %v547_v3  ;;  %627 = vmatpush.msra.mxu3 %v548_v5  ;;  %v439_v6 = vld [vmem:[#allocation7 + $0x270] sm:$0xff]  ;;  %v541_v7 = vld [vmem:[#allocation7 + $0x5a0] sm:$0xff]  ;;  %v440_v8 = vld [vmem:[#allocation7 + $0x278] sm:$0xff]  ;;  %s1655_s13 = sld [smem:[#allocation2 + $0x3]]  ;;  %s1511_s2 = scalar_lea.hbm %s2427_s7, %s1665_s10 }
  0x47   : > { %568 = vmatpush.msra.mxu0 %v445_v2  ;;  %608 = vmatpush.msra.mxu2 %v446_v4  ;;  %v542_v9 = vld [vmem:[#allocation7 + $0x5a8] sm:$0xff]  ;;  %v535_v10 = vld [vmem:[#allocation7 + $0x570] sm:$0xff]  ;;  %v433_v11 = vld [vmem:[#allocation7 + $0x240] sm:$0xff]  ;;  %s1651_s17 = sld [smem:[#allocation2 + $0x2]]  ;;  %s1974_s14 = scalar_lea.hbm %s2427_s7, 32 }
  0x48   : > { %588 = vmatpush.msra.mxu1 %v541_v7  ;;  %628 = vmatpush.msra.mxu3 %v542_v9  ;;  %v434_v12 = vld [vmem:[#allocation7 + $0x248] sm:$0xff]  ;;  %v536_v13 = vld [vmem:[#allocation7 + $0x578] sm:$0xff]  ;;  %v529_v14 = vld [vmem:[#allocation7 + $0x540] sm:$0xff] }
  0x49   : > { %569 = vmatpush.msra.mxu0 %v439_v6  ;;  %609 = vmatpush.msra.mxu2 %v440_v8  ;;  %v530_v15 = vld [vmem:[#allocation7 + $0x548] sm:$0xff]  ;;  %v427_v16 = vld [vmem:[#allocation7 + $0x210] sm:$0xff]  ;;  %v428_v17 = vld [vmem:[#allocation7 + $0x218] sm:$0xff] }
  0x4a   : > { %589 = vmatpush.msra.mxu1 %v535_v10  ;;  %629 = vmatpush.msra.mxu3 %v536_v13  ;;  %v523_v18 = vld [vmem:[#allocation7 + $0x510] sm:$0xff]  ;;  %v524_v19 = vld [vmem:[#allocation7 + $0x518] sm:$0xff]  ;;  %v421_v20 = vld [vmem:[#allocation7 + $0x1e0] sm:$0xff] }
  0x4b   : > { %570 = vmatpush.msra.mxu0 %v433_v11  ;;  %610 = vmatpush.msra.mxu2 %v434_v12  ;;  %v422_v21 = vld [vmem:[#allocation7 + $0x1e8] sm:$0xff]  ;;  %v517_v22 = vld [vmem:[#allocation7 + $0x4e0] sm:$0xff]  ;;  %v415_v24 = vld [vmem:[#allocation7 + $0x1b0] sm:$0xff] }
  0x4c   : > { %590 = vmatpush.msra.mxu1 %v529_v14  ;;  %630 = vmatpush.msra.mxu3 %v530_v15  ;;  %v518_v23 = vld [vmem:[#allocation7 + $0x4e8] sm:$0xff]  ;;  %v416_v25 = vld [vmem:[#allocation7 + $0x1b8] sm:$0xff]  ;;  %v511_v26 = vld [vmem:[#allocation7 + $0x4b0] sm:$0xff] }
  0x4d   : > { %571 = vmatpush.msra.mxu0 %v427_v16  ;;  %611 = vmatpush.msra.mxu2 %v428_v17  ;;  %v512_v27 = vld [vmem:[#allocation7 + $0x4b8] sm:$0xff]  ;;  %v409_v28 = vld [vmem:[#allocation7 + $0x180] sm:$0xff]  ;;  %v410_v29 = vld [vmem:[#allocation7 + $0x188] sm:$0xff] }
  0x4e   : > { %591 = vmatpush.msra.mxu1 %v523_v18  ;;  %631 = vmatpush.msra.mxu3 %v524_v19  ;;  %v505_v30 = vld [vmem:[#allocation7 + $0x480] sm:$0xff]  ;;  %v506_v31 = vld [vmem:[#allocation7 + $0x488] sm:$0xff]  ;;  %v403_v32 = vld [vmem:[#allocation7 + $0x150] sm:$0xff] }
  0x4f   : > { %572 = vmatpush.msra.mxu0 %v421_v20  ;;  %612 = vmatpush.msra.mxu2 %v422_v21  ;;  %v404_v33 = vld [vmem:[#allocation7 + $0x158] sm:$0xff]  ;;  %v499_v34 = vld [vmem:[#allocation7 + $0x450] sm:$0xff]  ;;  %v397_v36 = vld [vmem:[#allocation7 + $0x120] sm:$0xff] }
  0x50   : > { %592 = vmatpush.msra.mxu1 %v517_v22  ;;  %632 = vmatpush.msra.mxu3 %v518_v23  ;;  %v500_v35 = vld [vmem:[#allocation7 + $0x458] sm:$0xff]  ;;  %v398_v37 = vld [vmem:[#allocation7 + $0x128] sm:$0xff]  ;;  %v493_v38 = vld [vmem:[#allocation7 + $0x420] sm:$0xff] }
  0x51   : > { %573 = vmatpush.msra.mxu0 %v415_v24  ;;  %613 = vmatpush.msra.mxu2 %v416_v25  ;;  %v494_v39 = vld [vmem:[#allocation7 + $0x428] sm:$0xff]  ;;  %v391_v40 = vld [vmem:[#allocation7 + $0xf0] sm:$0xff]  ;;  %v392_v41 = vld [vmem:[#allocation7 + $0xf8] sm:$0xff] }
  0x52   : > { %593 = vmatpush.msra.mxu1 %v511_v26  ;;  %633 = vmatpush.msra.mxu3 %v512_v27  ;;  %v487_v42 = vld [vmem:[#allocation7 + $0x3f0] sm:$0xff]  ;;  %v488_v43 = vld [vmem:[#allocation7 + $0x3f8] sm:$0xff]  ;;  %v385_v44 = vld [vmem:[#allocation7 + $0xc0] sm:$0xff] }
  0x53   : > { %574 = vmatpush.msra.mxu0 %v409_v28  ;;  %614 = vmatpush.msra.mxu2 %v410_v29  ;;  %v386_v45 = vld [vmem:[#allocation7 + $0xc8] sm:$0xff]  ;;  %v481_v46 = vld [vmem:[#allocation7 + $0x3c0] sm:$0xff]  ;;  %v379_v48 = vld [vmem:[#allocation7 + $0x90] sm:$0xff] }
  0x54   : > { %594 = vmatpush.msra.mxu1 %v505_v30  ;;  %634 = vmatpush.msra.mxu3 %v506_v31  ;;  %v482_v47 = vld [vmem:[#allocation7 + $0x3c8] sm:$0xff]  ;;  %v380_v49 = vld [vmem:[#allocation7 + $0x98] sm:$0xff]  ;;  %v475_v50 = vld [vmem:[#allocation7 + $0x390] sm:$0xff] }
  0x55   : > { %575 = vmatpush.msra.mxu0 %v403_v32  ;;  %615 = vmatpush.msra.mxu2 %v404_v33  ;;  %v476_v51 = vld [vmem:[#allocation7 + $0x398] sm:$0xff]  ;;  %v373_v52 = vld [vmem:[#allocation7 + $0x60] sm:$0xff]  ;;  %v374_v53 = vld [vmem:[#allocation7 + $0x68] sm:$0xff] }
  0x56   : > { %595 = vmatpush.msra.mxu1 %v499_v34  ;;  %635 = vmatpush.msra.mxu3 %v500_v35  ;;  %v469_v54 = vld [vmem:[#allocation7 + $0x360] sm:$0xff]  ;;  %v470_v55 = vld [vmem:[#allocation7 + $0x368] sm:$0xff]  ;;  %v367_v56 = vld [vmem:[#allocation7 + $0x30] sm:$0xff] }
  0x57   : > { %576 = vmatpush.msra.mxu0 %v397_v36  ;;  %616 = vmatpush.msra.mxu2 %v398_v37  ;;  %v368_v57 = vld [vmem:[#allocation7 + $0x38] sm:$0xff]  ;;  %v463_v58 = vld [vmem:[#allocation7 + $0x330] sm:$0xff]  ;;  %v361_v60 = vld [vmem:[#allocation7] sm:$0xff] }
  0x58   : > { %596 = vmatpush.msra.mxu1 %v493_v38  ;;  %636 = vmatpush.msra.mxu3 %v494_v39  ;;  %v464_v59 = vld [vmem:[#allocation7 + $0x338] sm:$0xff]  ;;  %v362_v61 = vld [vmem:[#allocation7 + $0x8] sm:$0xff]  ;;  %v453_v62 = vld [vmem:[#allocation7 + $0x2e0] sm:$0xff] }
  0x59   : > { %577 = vmatpush.msra.mxu0 %v391_v40  ;;  %617 = vmatpush.msra.mxu2 %v392_v41  ;;  %v454_v63 = vld [vmem:[#allocation7 + $0x2e8] sm:$0xff]  ;;  %v457_v0 = vld [vmem:[#allocation7 + $0x300] sm:$0xff]  ;;  %v447_v2 = vld [vmem:[#allocation7 + $0x2b0] sm:$0xff] }
  0x5a   : > { %597 = vmatpush.msra.mxu1 %v487_v42  ;;  %637 = vmatpush.msra.mxu3 %v488_v43  ;;  %v458_v1 = vld [vmem:[#allocation7 + $0x308] sm:$0xff]  ;;  %v549_v3 = vld [vmem:[#allocation7 + $0x5e0] sm:$0xff]  ;;  %v448_v4 = vld [vmem:[#allocation7 + $0x2b8] sm:$0xff] }
  0x5b   : > { %578 = vmatpush.msra.mxu0 %v385_v44  ;;  %618 = vmatpush.msra.mxu2 %v386_v45  ;;  %v550_v5 = vld [vmem:[#allocation7 + $0x5e8] sm:$0xff]  ;;  %v441_v6 = vld [vmem:[#allocation7 + $0x280] sm:$0xff]  ;;  %v543_v7 = vld [vmem:[#allocation7 + $0x5b0] sm:$0xff] }
  0x5c   : > { %598 = vmatpush.msra.mxu1 %v481_v46  ;;  %638 = vmatpush.msra.mxu3 %v482_v47  ;;  %v442_v8 = vld [vmem:[#allocation7 + $0x288] sm:$0xff]  ;;  %v544_v9 = vld [vmem:[#allocation7 + $0x5b8] sm:$0xff]  ;;  %v435_v10 = vld [vmem:[#allocation7 + $0x250] sm:$0xff] }
  0x5d   : > { %579 = vmatpush.msra.mxu0 %v379_v48  ;;  %619 = vmatpush.msra.mxu2 %v380_v49  ;;  %v537_v11 = vld [vmem:[#allocation7 + $0x580] sm:$0xff]  ;;  %v436_v12 = vld [vmem:[#allocation7 + $0x258] sm:$0xff]  ;;  %v538_v13 = vld [vmem:[#allocation7 + $0x588] sm:$0xff] }
  0x5e   : > { %599 = vmatpush.msra.mxu1 %v475_v50  ;;  %639 = vmatpush.msra.mxu3 %v476_v51  ;;  %v429_v14 = vld [vmem:[#allocation7 + $0x220] sm:$0xff]  ;;  %v531_v15 = vld [vmem:[#allocation7 + $0x550] sm:$0xff]  ;;  %v430_v16 = vld [vmem:[#allocation7 + $0x228] sm:$0xff] }
  0x5f   : > { %580 = vmatpush.msra.mxu0 %v373_v52  ;;  %620 = vmatpush.msra.mxu2 %v374_v53  ;;  %v532_v17 = vld [vmem:[#allocation7 + $0x558] sm:$0xff]  ;;  %v423_v18 = vld [vmem:[#allocation7 + $0x1f0] sm:$0xff]  ;;  %v525_v19 = vld [vmem:[#allocation7 + $0x520] sm:$0xff] }
  0x60   : > { %600 = vmatpush.msra.mxu1 %v469_v54  ;;  %640 = vmatpush.msra.mxu3 %v470_v55  ;;  %v424_v20 = vld [vmem:[#allocation7 + $0x1f8] sm:$0xff]  ;;  %v526_v21 = vld [vmem:[#allocation7 + $0x528] sm:$0xff]  ;;  %v417_v22 = vld [vmem:[#allocation7 + $0x1c0] sm:$0xff] }
  0x61   : > { %581 = vmatpush.msra.mxu0 %v367_v56  ;;  %621 = vmatpush.msra.mxu2 %v368_v57  ;;  %v519_v23 = vld [vmem:[#allocation7 + $0x4f0] sm:$0xff]  ;;  %v418_v24 = vld [vmem:[#allocation7 + $0x1c8] sm:$0xff]  ;;  %v520_v25 = vld [vmem:[#allocation7 + $0x4f8] sm:$0xff] }
  0x62   : > { %601 = vmatpush.msra.mxu1 %v463_v58  ;;  %641 = vmatpush.msra.mxu3 %v464_v59  ;;  %v411_v26 = vld [vmem:[#allocation7 + $0x190] sm:$0xff]  ;;  %v513_v27 = vld [vmem:[#allocation7 + $0x4c0] sm:$0xff]  ;;  %v412_v28 = vld [vmem:[#allocation7 + $0x198] sm:$0xff] }
  0x63   : > { %582 = vmatpush.msra.mxu0 %v361_v60  ;;  %622 = vmatpush.msra.mxu2 %v362_v61  ;;  %v514_v29 = vld [vmem:[#allocation7 + $0x4c8] sm:$0xff]  ;;  %v405_v30 = vld [vmem:[#allocation7 + $0x160] sm:$0xff]  ;;  %v507_v31 = vld [vmem:[#allocation7 + $0x490] sm:$0xff] }
  0x64   : > { %602 = vmatpush.msra.mxu1 %v457_v0  ;;  %642 = vmatpush.msra.mxu3 %v458_v1  ;;  %v406_v32 = vld [vmem:[#allocation7 + $0x168] sm:$0xff]  ;;  %v508_v33 = vld [vmem:[#allocation7 + $0x498] sm:$0xff]  ;;  %v399_v34 = vld [vmem:[#allocation7 + $0x130] sm:$0xff] }
  0x65   : > { %647 = vmatpush.msrb.mxu0 %v453_v62  ;;  %687 = vmatpush.msrb.mxu2 %v454_v63  ;;  %v501_v35 = vld [vmem:[#allocation7 + $0x460] sm:$0xff]  ;;  %v400_v36 = vld [vmem:[#allocation7 + $0x138] sm:$0xff]  ;;  %v502_v37 = vld [vmem:[#allocation7 + $0x468] sm:$0xff] }
  0x66   : > { %667 = vmatpush.msrb.mxu1 %v549_v3  ;;  %707 = vmatpush.msrb.mxu3 %v550_v5  ;;  %v393_v38 = vld [vmem:[#allocation7 + $0x100] sm:$0xff]  ;;  %v495_v39 = vld [vmem:[#allocation7 + $0x430] sm:$0xff]  ;;  %v394_v40 = vld [vmem:[#allocation7 + $0x108] sm:$0xff] }
  0x67   : > { %648 = vmatpush.msrb.mxu0 %v447_v2  ;;  %688 = vmatpush.msrb.mxu2 %v448_v4  ;;  %v496_v41 = vld [vmem:[#allocation7 + $0x438] sm:$0xff]  ;;  %v387_v42 = vld [vmem:[#allocation7 + $0xd0] sm:$0xff]  ;;  %v489_v43 = vld [vmem:[#allocation7 + $0x400] sm:$0xff] }
  0x68   : > { %668 = vmatpush.msrb.mxu1 %v543_v7  ;;  %708 = vmatpush.msrb.mxu3 %v544_v9  ;;  %v388_v44 = vld [vmem:[#allocation7 + $0xd8] sm:$0xff]  ;;  %v490_v45 = vld [vmem:[#allocation7 + $0x408] sm:$0xff]  ;;  %v2228_v46 = vld [vmem:[%s2213_s11] sm:$0xff] }
  0x69   : > { %649 = vmatpush.msrb.mxu0 %v441_v6  ;;  %689 = vmatpush.msrb.mxu2 %v442_v8  ;;  %v381_v47 = vld [vmem:[#allocation7 + $0xa0] sm:$0xff]  ;;  %v483_v48 = vld [vmem:[#allocation7 + $0x3d0] sm:$0xff]  ;;  %v382_v49 = vld [vmem:[#allocation7 + $0xa8] sm:$0xff] }
  0x6a   : > { %669 = vmatpush.msrb.mxu1 %v537_v11  ;;  %709 = vmatpush.msrb.mxu3 %v538_v13  ;;  %v484_v50 = vld [vmem:[#allocation7 + $0x3d8] sm:$0xff]  ;;  %v375_v52 = vld [vmem:[#allocation7 + $0x70] sm:$0xff]  ;;  %v477_v53 = vld [vmem:[#allocation7 + $0x3a0] sm:$0xff] }
  0x6b   : > { %650 = vmatpush.msrb.mxu0 %v435_v10  ;;  %690 = vmatpush.msrb.mxu2 %v436_v12  ;;  %v2233_v51 = vld [vmem:[%s2213_s11 + $0x8] sm:$0xff]  ;;  %v369_v56 = vld [vmem:[#allocation7 + $0x40] sm:$0xff]  ;;  %v471_v57 = vld [vmem:[#allocation7 + $0x370] sm:$0xff] }
  0x6c   : > { %670 = vmatpush.msrb.mxu1 %v531_v15  ;;  %710 = vmatpush.msrb.mxu3 %v532_v17  ;;  %v376_v54 = vld [vmem:[#allocation7 + $0x78] sm:$0xff]  ;;  %v478_v55 = vld [vmem:[#allocation7 + $0x3a8] sm:$0xff]  ;;  %v363_v60 = vld [vmem:[#allocation7 + $0x10] sm:$0xff] }
  0x6d   : > { %651 = vmatpush.msrb.mxu0 %v429_v14  ;;  %691 = vmatpush.msrb.mxu2 %v430_v16  ;;  %v370_v58 = vld [vmem:[#allocation7 + $0x48] sm:$0xff]  ;;  %v472_v59 = vld [vmem:[#allocation7 + $0x378] sm:$0xff]  ;;  %v465_v61 = vld [vmem:[#allocation7 + $0x340] sm:$0xff] }
  0x6e   : > { %671 = vmatpush.msrb.mxu1 %v525_v19  ;;  %711 = vmatpush.msrb.mxu3 %v526_v21  ;;  %v364_v62 = vld [vmem:[#allocation7 + $0x18] sm:$0xff]  ;;  %v466_v63 = vld [vmem:[#allocation7 + $0x348] sm:$0xff]  ;;  %v459_v0 = vld [vmem:[#allocation7 + $0x310] sm:$0xff] }
  0x6f   : > { %652 = vmatpush.msrb.mxu0 %v423_v18  ;;  %692 = vmatpush.msrb.mxu2 %v424_v20  ;;  %v460_v1 = vld [vmem:[#allocation7 + $0x318] sm:$0xff]  ;;  %v2241_v4 = vld [vmem:[#allocation9] sm:$0x3f] }
  0x70   : > { %672 = vmatpush.msrb.mxu1 %v519_v23  ;;  %712 = vmatpush.msrb.mxu3 %v520_v25  ;;  %v557_v6 = vperm.slane %v2241_v4, 2  ;;  %v555_v9 = vperm.slane %v2241_v4, 0  ;;  %v558_v13 = vperm.slane %v2241_v4, 3  ;;  %v556_v15 = vperm.slane %v2241_v4, 1 }
  0x71   : > { %653 = vmatpush.msrb.mxu0 %v417_v22  ;;  %693 = vmatpush.msrb.mxu2 %v418_v24 }
  0x72   : > { %673 = vmatpush.msrb.mxu1 %v513_v27  ;;  %713 = vmatpush.msrb.mxu3 %v514_v29 }
  0x73   : > { %654 = vmatpush.msrb.mxu0 %v411_v26  ;;  %694 = vmatpush.msrb.mxu2 %v412_v28 }
  0x74   : > { %674 = vmatpush.msrb.mxu1 %v507_v31  ;;  %714 = vmatpush.msrb.mxu3 %v508_v33 }
  0x75   : > { %655 = vmatpush.msrb.mxu0 %v405_v30  ;;  %695 = vmatpush.msrb.mxu2 %v406_v32 }
  0x76   : > { %675 = vmatpush.msrb.mxu1 %v501_v35  ;;  %715 = vmatpush.msrb.mxu3 %v502_v37 }
  0x77   : > { %656 = vmatpush.msrb.mxu0 %v399_v34  ;;  %696 = vmatpush.msrb.mxu2 %v400_v36 }
  0x78   : > { %676 = vmatpush.msrb.mxu1 %v495_v39  ;;  %716 = vmatpush.msrb.mxu3 %v496_v41  ;;  %v449_v39 = vld [vmem:[#allocation7 + $0x2c0] sm:$0xff] }
  0x79   : > { %657 = vmatpush.msrb.mxu0 %v393_v38  ;;  %697 = vmatpush.msrb.mxu2 %v394_v40  ;;  %v455_v38 = vld [vmem:[#allocation7 + $0x2f0] sm:$0xff]  ;;  %v437_v41 = vld [vmem:[#allocation7 + $0x260] sm:$0xff] }
  0x7a   : > { %677 = vmatpush.msrb.mxu1 %v489_v43  ;;  %717 = vmatpush.msrb.mxu3 %v490_v45  ;;  %v443_v40 = vld [vmem:[#allocation7 + $0x290] sm:$0xff]  ;;  %v425_v43 = vld [vmem:[#allocation7 + $0x200] sm:$0xff] }
  0x7b   : > { %658 = vmatpush.msrb.mxu0 %v387_v42  ;;  %698 = vmatpush.msrb.mxu2 %v388_v44  ;;  %v431_v42 = vld [vmem:[#allocation7 + $0x230] sm:$0xff]  ;;  %v413_v45 = vld [vmem:[#allocation7 + $0x1a0] sm:$0xff] }
  0x7c   : > { %583 = vmatmul.f32.vlgmr.msra.gmra.mxu0 %v2228_v46  ;;  %623 = vmatmul.f32.vlgmr.msra.gmra.mxu2 %v2228_v46  ;;  %v419_v44 = vld [vmem:[#allocation7 + $0x1d0] sm:$0xff] }
  0x7d   : > { %659 = vmatpush.msrb.mxu0 %v381_v47  ;;  %678 = vmatpush.msrb.mxu1 %v483_v48  ;;  %v407_v47 = vld [vmem:[#allocation7 + $0x170] sm:$0xff]  ;;  %v401_v48 = vld [vmem:[#allocation7 + $0x140] sm:$0xff] }
  0x7e   : > { %699 = vmatpush.msrb.mxu2 %v382_v49  ;;  %718 = vmatpush.msrb.mxu3 %v484_v50  ;;  %v395_v49 = vld [vmem:[#allocation7 + $0x110] sm:$0xff]  ;;  %v389_v50 = vld [vmem:[#allocation7 + $0xe0] sm:$0xff] }
  0x7f   : > { %603 = vmatmul.f32.vlgmr.msra.gmra.mxu1 %v2233_v51  ;;  %643 = vmatmul.f32.vlgmr.msra.gmra.mxu3 %v2233_v51 }
  0x80   : > { %660 = vmatpush.msrb.mxu0 %v375_v52  ;;  %679 = vmatpush.msrb.mxu1 %v477_v53  ;;  %v383_v52 = vld [vmem:[#allocation7 + $0xb0] sm:$0xff] }
  0x81   : > { %700 = vmatpush.msrb.mxu2 %v376_v54  ;;  %719 = vmatpush.msrb.mxu3 %v478_v55  ;;  %v377_v54 = vld [vmem:[#allocation7 + $0x80] sm:$0xff]  ;;  %v371_v55 = vld [vmem:[#allocation7 + $0x50] sm:$0xff] }
  0x82   : > { %661 = vmatpush.msrb.mxu0 %v369_v56  ;;  %680 = vmatpush.msrb.mxu1 %v471_v57  ;;  %v365_v57 = vld [vmem:[#allocation7 + $0x20] sm:$0xff] }
  0x83   : > { %701 = vmatpush.msrb.mxu2 %v370_v58  ;;  %720 = vmatpush.msrb.mxu3 %v472_v59 }
  0x84   : > { %662 = vmatpush.msrb.mxu0 %v363_v60  ;;  %681 = vmatpush.msrb.mxu1 %v465_v61 }
  0x85   : > { %702 = vmatpush.msrb.mxu2 %v364_v62  ;;  %721 = vmatpush.msrb.mxu3 %v466_v63 }
  0x86   : > { %663 = vmatmul.f32.vlgmr.msrb.gmra.mxu0 %v2228_v46  ;;  %703 = vmatmul.f32.vlgmr.msrb.gmra.mxu2 %v2228_v46 }
  0x87   : > { %682 = vmatpush.msrb.mxu1 %v459_v0  ;;  %722 = vmatpush.msrb.mxu3 %v460_v1 }
  0x88   : > { %683 = vmatmul.f32.vlgmr.msrb.gmra.mxu1 %v2233_v51  ;;  %723 = vmatmul.f32.vlgmr.msrb.gmra.mxu3 %v2233_v51 }
  0x89   : > { %727 = vmatpush.msra.mxu0 %v455_v38 }
  0x8b   : > { %728 = vmatpush.msra.mxu0 %v449_v39 }
  0x8d   : > { %729 = vmatpush.msra.mxu0 %v443_v40 }
  0x8f   : > { %730 = vmatpush.msra.mxu0 %v437_v41 }
  0x91   : > { %731 = vmatpush.msra.mxu0 %v431_v42 }
  0x93   : > { %732 = vmatpush.msra.mxu0 %v425_v43 }
  0x95   : > { %733 = vmatpush.msra.mxu0 %v419_v44 }
  0x97   : > { %734 = vmatpush.msra.mxu0 %v413_v45 }
  0x99   : > { %735 = vmatpush.msra.mxu0 %v407_v47 }
  0x9b   : > { %736 = vmatpush.msra.mxu0 %v401_v48 }
  0x9d   : > { %737 = vmatpush.msra.mxu0 %v395_v49 }
  0x9f   : > { %738 = vmatpush.msra.mxu0 %v389_v50 }
  0xa1   : > { %739 = vmatpush.msra.mxu0 %v383_v52 }
  0xa3   : > { %740 = vmatpush.msra.mxu0 %v377_v54 }
  0xa5   : > { %741 = vmatpush.msra.mxu0 %v371_v55 }
  0xa7   : > { %742 = vmatpush.msra.mxu0 %v365_v57  ;;  %v839_v57 = vstv %s2311_s12 }
  0xa8   : > { %743 = vmatmul.f32.vlgmr.msra.gmra.mxu0 %v2228_v46 }
  0xf9   : > { %v584_v2 = vpop.f32.mrf.mxu0 }
  0xfa   : > { %v585_v14 = vadd.f32 %v584_v2, %v555_v9 }
  0xfc   : > { %v604_v3 = vpop.f32.mrf.mxu1 }
  0xfd   : > { %v2252_v20 = vadd.f32 %v604_v3, %v585_v14 }
  0xff   : > { %v624_v5 = vpop.f32.mrf.mxu2  ;;  %v807_v25 = vmul.f32 %v2252_v20, %v2252_v20 }
 0x100   : > { %v625_v21 = vadd.f32 %v624_v5, %v556_v15 }
 0x101   : > { %v809_v37 = vsel %vm808_vm0, %v807_v25, 0.0 }
 0x102   : > { %v644_v7 = vpop.f32.mrf.mxu3 }
 0x103   : > { %v664_v8 = vpop.f32.mrf.mxu0  ;;  %v2260_v24 = vadd.f32 %v644_v7, %v625_v21  ;;  %v456_v21 = vld [vmem:[#allocation7 + $0x2f8] sm:$0xff] }
 0x104   : > { %v665_v10 = vadd.f32 %v664_v8, %v557_v6  ;;  %767 = vmatpush.msra.mxu2 %v456_v21  ;;  %v414_v21 = vld [vmem:[#allocation7 + $0x1a8] sm:$0xff] }
 0x105   : > { %v684_v11 = vpop.f32.mrf.mxu1  ;;  %v1025_v26 = vmul.f32 %v2260_v24, %v2260_v24 }
 0x106   : > { %v2245_v12 = vadd.f32 %v684_v11, %v665_v10 }
 0x107   : > { %v1026_v36 = vsel %vm808_vm0, %v1025_v26, 0.0 }
 0x108   : > { %v823_v16 = vmul.f32 %v2245_v12, %v2245_v12 }
 0x109   : > { %v704_v17 = vpop.f32.mrf.mxu2 }
 0x10a   : > { %v705_v18 = vadd.f32 %v704_v17, %v558_v13  ;;  %929 = vrot.lane.b32.xlu0 %v823_v16, %s2042_s9  ;;  %v824_v35 = vsel %vm808_vm0, %v823_v16, 0.0 }
 0x10b   : > { %v724_v19 = vpop.f32.mrf.mxu3 }
 0x10c   : > { %v2254_v22 = vadd.f32 %v724_v19, %v705_v18 }
 0x10e   : > { %v2258_v23 = vmul.f32 %v2254_v22, %v2254_v22 }
 0x110   : > { %1145 = vrot.lane.b32.xlu1 %v2258_v23, %s2042_s9 }
 0x112   : > { %911 = vrot.lane.b32.xlu0 %v807_v25, %s2042_s9  ;;  %v450_v25 = vld [vmem:[#allocation7 + $0x2c8] sm:$0xff] }
 0x113   : > { %768 = vmatpush.msra.mxu2 %v450_v25  ;;  %v516_v25 = vld [vmem:[#allocation7 + $0x4d8] sm:$0xff] }
 0x118   : > { %1127 = vrot.lane.b32.xlu1 %v1025_v26, %s2042_s9 }
 0x17c   : > { %v930_v27 = vpop.permute.xlu0 %929 }
 0x17d   : > { %v932_v28 = vsel %vm808_vm0, %v930_v27, 0.0  ;;  %v947_v27 = vstv %s2290_s15  ;;  %s1500_s15 = scalar_lea.sflag [#allocation4], %s2207_s21 }
 0x17e   : > { %933 = vadd.xlane.f32.xlu2 %v932_v28  ;;  %v552_v28 = vld [vmem:[#allocation7 + $0x5f8] sm:$0xff] }
 0x17f   : > { %787 = vmatpush.msra.mxu3 %v552_v28  ;;  %v510_v28 = vld [vmem:[#allocation7 + $0x4a8] sm:$0xff] }
 0x182   : > { %v1146_v29 = vpop.permute.xlu1 %1145 }
 0x183   : > { %v1148_v30 = vsel %vm808_vm0, %v1146_v29, 0.0 }
 0x184   : > { %1149 = vadd.xlane.f32.xlu0 %v1148_v30  ;;  %v912_v31 = vpop.permute.xlu0 %911 }
 0x185   : > { %v914_v32 = vsel %vm808_vm0, %v912_v31, 0.0 }
 0x186   : > { %915 = vadd.xlane.f32.xlu2 %v914_v32 }
 0x18a   : > { %v1128_v33 = vpop.permute.xlu1 %1127 }
 0x18b   : > { %v1130_v34 = vsel %vm808_vm0, %v1128_v33, 0.0 }
 0x18c   : > { %1131 = vadd.xlane.f32.xlu1 %v1130_v34  ;;  %825 = vadd.xlane.f32.xlu0 %v824_v35 }
 0x194   : > { %1027 = vadd.xlane.f32.xlu0 %v1026_v36  ;;  %810 = vadd.xlane.f32.xlu1 %v809_v37 }
 0x1f1   : > { %v934_v53 = vpop.xlane.xlu2 %933 }
 0x1f2   : > { %v2277_v56 = vmax.f32 %v934_v53, 1e-24 }
 0x1f4   : > { %1765 = vrsqrt.f32 %v2277_v56  ;;  %vm942_vm7 = vweird.f32 %v2277_v56 }
 0x1f7   : > { %v1150_v58 = vpop.xlane.xlu0 %1149 }
 0x1f8   : > { %v2281_v61 = vmax.f32 %v1150_v58, 1e-24 }
 0x1f9   : > { %v916_v59 = vpop.xlane.xlu2 %915 }
 0x1fa   : > { %v917_v60 = vmax.f32 %v916_v59, 1e-24  ;;  %v2283_v62 = vpop.eup %1765  ;;  %vm1158_vm10 = vweird.f32 %v2281_v61 }
 0x1fb   : > { %v937_v3 = vmul.f32 %v2283_v62, %v2277_v56  ;;  %vm943_vm5 = vweird.f32 %v2283_v62 }
 0x1fc   : > { %1767 = vrsqrt.f32 %v917_v60  ;;  %vm924_vm2 = vweird.f32 %v917_v60  ;;  %vm944_vm9 = vmor %vm942_vm7, %vm943_vm5 }
 0x1fd   : > { %1769 = vrsqrt.f32 %v2281_v61  ;;  %v938_v7 = vmul.f32 %v2283_v62, %v937_v3 }
 0x1ff   : > { %v1132_v63 = vpop.xlane.xlu1 %1131  ;;  %v826_v0 = vpop.xlane.xlu0 %825  ;;  %v939_v15 = vmul.f32 0.5, %v938_v7  ;;  %v546_v7 = vld [vmem:[#allocation7 + $0x5c8] sm:$0xff] }
 0x200   : > { %v2286_v1 = vmax.f32 %v1132_v63, 1e-24  ;;  %v827_v2 = vmax.f32 %v826_v0, 1e-24  ;;  %788 = vmatpush.msra.mxu3 %v546_v7 }
 0x201   : > { %v940_v30 = vsub.f32 1.5, %v939_v15  ;;  %v528_v15 = vld [vmem:[#allocation7 + $0x538] sm:$0xff] }
 0x202   : > { %v1768_v5 = vpop.eup %1767  ;;  %1771 = vrsqrt.f32 %v827_v2  ;;  %vm834_vm6 = vweird.f32 %v827_v2 }
 0x203   : > { %v919_v6 = vmul.f32 %v1768_v5, %v917_v60  ;;  %1773 = vrsqrt.f32 %v2286_v1  ;;  %v2294_v9 = vpop.eup %1769  ;;  %vm925_vm1 = vweird.f32 %v1768_v5  ;;  %v941_v41 = vmul.f32 %v2283_v62, %v940_v30  ;;  %v402_v30 = vld [vmem:[#allocation7 + $0x148] sm:$0xff] }
 0x204   : > { %v1153_v16 = vmul.f32 %v2294_v9, %v2281_v61  ;;  %vm926_vm3 = vmor %vm924_vm2, %vm925_vm1  ;;  %vm1159_vm11 = vweird.f32 %v2294_v9  ;;  %vm1140_vm2 = vweird.f32 %v2286_v1 }
 0x205   : > { %v920_v8 = vmul.f32 %v1768_v5, %v919_v6  ;;  %v945_v50 = vsel %vm944_vm9, %v2283_v62, %v941_v41  ;;  %vm1160_vm13 = vmor %vm1158_vm10, %vm1159_vm11  ;;  %v444_v6 = vld [vmem:[#allocation7 + $0x298] sm:$0xff]  ;;  %v491_v41 = vld [vmem:[#allocation7 + $0x410] sm:$0xff]  ;;  %vm869_vm10 = vcmask 64512  }
 0x206   : > { %v1154_v31 = vmul.f32 %v2294_v9, %v1153_v16  ;;  %v950_v54 = vmul.f32 %v945_v50, %v2245_v12  ;;  %769 = vmatpush.msra.mxu2 %v444_v6  ;;  %v533_v16 = vld [vmem:[#allocation7 + $0x560] sm:$0xff]  ;;  %v479_v50 = vld [vmem:[#allocation7 + $0x3b0] sm:$0xff]  ;;  %v744_v6 = vpop.f32.mrf.mxu0 }
 0x207   : > { %v921_v10 = vmul.f32 0.5, %v920_v8  ;;  %v811_v11 = vpop.xlane.xlu1 %810  ;;  %v551_v8 = vld [vmem:[#allocation7 + $0x5f0] sm:$0xff] }
 0x208   : > { %v2296_v13 = vmax.f32 %v811_v11, 1e-24  ;;  %v1772_v14 = vpop.eup %1771  ;;  %v1155_v39 = vmul.f32 0.5, %v1154_v31  ;;  %747 = vmatpush.msra.mxu1 %v551_v8  ;;  %v545_v11 = vld [vmem:[#allocation7 + $0x5c0] sm:$0xff]  ;;  %v504_v31 = vld [vmem:[#allocation7 + $0x478] sm:$0xff] }
 0x209   : > { %v922_v17 = vsub.f32 1.5, %v921_v10  ;;  %v2300_v18 = vpop.eup %1773  ;;  %v829_v19 = vmul.f32 %v1772_v14, %v827_v2  ;;  %vm835_vm4 = vweird.f32 %v1772_v14  ;;  %v1163_v2 = vstv %s1655_s13  ;;  %v534_v10 = vld [vmem:[#allocation7 + $0x568] sm:$0xff] }
 0x20a   : > { %1775 = vrsqrt.f32 %v2296_v13  ;;  %v1135_v32 = vmul.f32 %v2300_v18, %v2286_v1  ;;  %vm836_vm8 = vmor %vm834_vm6, %vm835_vm4  ;;  %v1156_v47 = vsub.f32 1.5, %v1155_v39  ;;  %vm819_vm14 = vweird.f32 %v2296_v13  ;;  %v438_v1 = vld [vmem:[#allocation7 + $0x268] sm:$0xff]  ;;  %748 = vmatpush.msra.mxu1 %v545_v11  ;;  %v384_v39 = vld [vmem:[#allocation7 + $0xb8] sm:$0xff] }
 0x20b   : > { %v923_v26 = vmul.f32 %v1768_v5, %v922_v17  ;;  %v830_v29 = vmul.f32 %v1772_v14, %v829_v19  ;;  %vm1141_vm1 = vweird.f32 %v2300_v18  ;;  %770 = vmatpush.msra.mxu2 %v438_v1  ;;  %v420_v17 = vld [vmem:[#allocation7 + $0x1d8] sm:$0xff]  ;;  %v527_v19 = vld [vmem:[#allocation7 + $0x530] sm:$0xff]  ;;  %v560_v1 = vperm.slane %v2241_v4, 5 }
 0x20c   : > { %v1136_v40 = vmul.f32 %v2300_v18, %v1135_v32  ;;  %v1157_v56 = vmul.f32 %v2294_v9, %v1156_v47  ;;  %v509_v32 = vld [vmem:[#allocation7 + $0x4a0] sm:$0xff] }
 0x20d   : > { %v927_v33 = vsel %vm926_vm3, %v1768_v5, %v923_v26  ;;  %v831_v34 = vmul.f32 0.5, %v830_v29  ;;  %vm1142_vm3 = vmor %vm1140_vm2, %vm1141_vm1  ;;  %v521_v26 = vld [vmem:[#allocation7 + $0x500] sm:$0xff]  ;;  %v515_v29 = vld [vmem:[#allocation7 + $0x4d0] sm:$0xff] }
 0x20e   : > { %v948_v35 = vmul.f32 %v947_v27, %v927_v33  ;;  %v1137_v48 = vmul.f32 0.5, %v1136_v40  ;;  %v408_v27 = vld [vmem:[#allocation7 + $0x178] sm:$0xff]  ;;  %v486_v40 = vld [vmem:[#allocation7 + $0x3e8] sm:$0xff]  ;;  %v485_v47 = vld [vmem:[#allocation7 + $0x3e0] sm:$0xff] }
 0x20f   : > { %v832_v36 = vsub.f32 1.5, %v831_v34  ;;  %v396_v33 = vld [vmem:[#allocation7 + $0x118] sm:$0xff]  ;;  %v498_v34 = vld [vmem:[#allocation7 + $0x448] sm:$0xff] }
 0x210   : > { %v949_v37 = vmul.f32 %v948_v35, %v2252_v20  ;;  %v1776_v38 = vpop.eup %1775  ;;  %v1138_v55 = vsub.f32 1.5, %v1137_v48  ;;  %v503_v35 = vld [vmem:[#allocation7 + $0x470] sm:$0xff]  ;;  %v366_v48 = vld [vmem:[#allocation7 + $0x28] sm:$0xff] }
 0x211   : > { %v833_v42 = vmul.f32 %v1772_v14, %v832_v36  ;;  %v814_v43 = vmul.f32 %v1776_v38, %v2296_v13  ;;  %vm820_vm12 = vweird.f32 %v1776_v38  ;;  %v539_v13 = vld [vmem:[#allocation7 + $0x590] sm:$0xff]  ;;  %v390_v36 = vld [vmem:[#allocation7 + $0xe8] sm:$0xff] }
 0x212   : > { %952 = vrot.lane.b32.xlu2 %v949_v37, %s2042_s9  ;;  %vm821_vm15 = vmor %vm819_vm14, %vm820_vm12  ;;  %v1139_v60 = vmul.f32 %v2300_v18, %v1138_v55  ;;  %749 = vmatpush.msra.mxu1 %v539_v13  ;;  %v492_v37 = vld [vmem:[#allocation7 + $0x418] sm:$0xff]  ;;  %v1041_v55 = vsel %vm808_vm0, %v2258_v23, 0.0  ;;  %v1028_v23 = vpop.xlane.xlu0 %1027 }
 0x213   : > { %v837_v44 = vsel %vm836_vm8, %v1772_v14, %v833_v42  ;;  %v815_v45 = vmul.f32 %v1776_v38, %v814_v43  ;;  %v426_v14 = vld [vmem:[#allocation7 + $0x208] sm:$0xff]  ;;  %v480_v43 = vld [vmem:[#allocation7 + $0x3b8] sm:$0xff] }
 0x214   : > { %v842_v49 = vmul.f32 %v837_v44, %v2245_v12  ;;  %v1161_v12 = vsel %vm1160_vm13, %v2294_v9, %v1157_v56  ;;  %v1143_v0 = vsel %vm1142_vm3, %v2300_v18, %v1139_v60  ;;  %v432_v9 = vld [vmem:[#allocation7 + $0x238] sm:$0xff]  ;;  %v522_v18 = vld [vmem:[#allocation7 + $0x508] sm:$0xff]  ;;  %750 = vmatpush.msra.mxu1 %v533_v16  ;;  %v461_v56 = vld [vmem:[#allocation7 + $0x320] sm:$0xff]  ;;  %v1029_v60 = vmax.f32 %v1028_v23, 1e-24 }
 0x215   : > { %v816_v52 = vmul.f32 0.5, %v815_v45  ;;  %v1166_v63 = vmul.f32 %v1161_v12, %v2254_v22  ;;  %v1164_v3 = vmul.f32 %v1163_v2, %v1143_v0  ;;  %771 = vmatpush.msra.mxu2 %v432_v9  ;;  %v378_v42 = vld [vmem:[#allocation7 + $0x88] sm:$0xff]  ;;  %v372_v44 = vld [vmem:[#allocation7 + $0x58] sm:$0xff]  ;;  %v559_v2 = vperm.slane %v2241_v4, 4 }
 0x216   : > { %1644 = vmatpush.xpose.msk.msrb.mxu0 %vm808_vm0, %v842_v49  ;;  %751 = vmatpush.msra.mxu1 %v527_v19  ;;  %v474_v45 = vld [vmem:[#allocation7 + $0x388] sm:$0xff]  ;;  %v468_v49 = vld [vmem:[#allocation7 + $0x358] sm:$0xff]  ;;  %1777 = vrsqrt.f32 %v1029_v60  ;;  %vm1036_vm5 = vweird.f32 %v1029_v60  ;;  %v1056_v19 = vstv %s1651_s17 }
 0x217   : > { %v817_v53 = vsub.f32 1.5, %v816_v52  ;;  %v1165_v5 = vmul.f32 %v1164_v3, %v2260_v24  ;;  %772 = vmatpush.msra.mxu2 %v426_v14  ;;  %v462_v52 = vld [vmem:[#allocation7 + $0x328] sm:$0xff] }
 0x218   : > { %752 = vmatpush.msra.mxu1 %v521_v26 }
 0x219   : > { %v818_v58 = vmul.f32 %v1776_v38, %v817_v53  ;;  %773 = vmatpush.msra.mxu2 %v420_v17  ;;  %v473_v53 = vld [vmem:[#allocation7 + $0x380] sm:$0xff] }
 0x21a   : > { %955 = vrot.lane.b32.xlu2 %v950_v54, %s2042_s9  ;;  %753 = vmatpush.msra.mxu1 %v515_v29  ;;  %v467_v54 = vld [vmem:[#allocation7 + $0x350] sm:$0xff] }
 0x21b   : > { %v822_v59 = vsel %vm821_vm15, %v1776_v38, %v818_v58  ;;  %774 = vmatpush.msra.mxu2 %v414_v21  ;;  %v497_v38 = vld [vmem:[#allocation7 + $0x440] sm:$0xff] }
 0x21c   : > { %v840_v61 = vmul.f32 %v839_v57, %v822_v59  ;;  %754 = vmatpush.msra.mxu1 %v509_v32 }
 0x21d   : > { %775 = vmatpush.msra.mxu2 %v408_v27 }
 0x21e   : > { %v841_v62 = vmul.f32 %v840_v61, %v2252_v20  ;;  %v540_v20 = vld [vmem:[#allocation7 + $0x598] sm:$0xff]  ;;  %755 = vmatpush.msra.mxu1 %v503_v35  ;;  %v1778_v61 = vpop.eup %1777 }
 0x21f   : > { %789 = vmatpush.msra.mxu3 %v540_v20  ;;  %776 = vmatpush.msra.mxu2 %v402_v30  ;;  %v1031_v12 = vmul.f32 %v1778_v61, %v1029_v60  ;;  %v745_v20 = vadd.f32 %v744_v6, %v559_v2  ;;  %vm1037_vm4 = vweird.f32 %v1778_v61 }
 0x220   : > { %1645 = vmatmul.msk.f32.vlgmr.msrb.gmra.mxu0 %vm808_vm0, %v841_v62  ;;  %756 = vmatpush.msra.mxu1 %v497_v38  ;;  %vm1038_vm6 = vmor %vm1036_vm5, %vm1037_vm4 }
 0x221   : > { %790 = vmatpush.msra.mxu3 %v534_v10  ;;  %777 = vmatpush.msra.mxu2 %v396_v33 }
 0x222   : > { %1171 = vrot.lane.b32.xlu2 %v1166_v63, %s2042_s9  ;;  %757 = vmatpush.msra.mxu1 %v491_v41  ;;  %v1032_v63 = vmul.f32 %v1778_v61, %v1031_v12 }
 0x223   : > { %791 = vmatpush.msra.mxu3 %v528_v15  ;;  %778 = vmatpush.msra.mxu2 %v390_v36 }
 0x224   : > { %758 = vmatpush.msra.mxu1 %v485_v47  ;;  %v1033_v0 = vmul.f32 0.5, %v1032_v63 }
 0x225   : > { %792 = vmatpush.msra.mxu3 %v522_v18  ;;  %779 = vmatpush.msra.mxu2 %v384_v39 }
 0x226   : > { %759 = vmatpush.msra.mxu1 %v479_v50 }
 0x227   : > { %793 = vmatpush.msra.mxu3 %v516_v25  ;;  %780 = vmatpush.msra.mxu2 %v378_v42 }
 0x228   : > { %760 = vmatpush.msra.mxu1 %v473_v53 }
 0x229   : > { %794 = vmatpush.msra.mxu3 %v510_v28  ;;  %781 = vmatpush.msra.mxu2 %v372_v44 }
 0x22a   : > { %1168 = vrot.lane.b32.xlu2 %v1165_v5, %s2042_s9  ;;  %761 = vmatpush.msra.mxu1 %v467_v54  ;;  %v1034_v5 = vsub.f32 1.5, %v1033_v0 }
 0x22b   : > { %795 = vmatpush.msra.mxu3 %v504_v31  ;;  %782 = vmatpush.msra.mxu2 %v366_v48 }
 0x22c   : > { %783 = vmatmul.f32.vlgmr.msra.gmra.mxu2 %v2228_v46  ;;  %762 = vmatpush.msra.mxu1 %v461_v56  ;;  %v1035_v9 = vmul.f32 %v1778_v61, %v1034_v5 }
 0x22d   : > { %796 = vmatpush.msra.mxu3 %v498_v34  ;;  %763 = vmatmul.f32.vlgmr.msra.gmra.mxu1 %v2233_v51 }
 0x22e   : > { %v1039_v21 = vsel %vm1038_vm6, %v1778_v61, %v1035_v9 }
 0x22f   : > { %797 = vmatpush.msra.mxu3 %v492_v37  ;;  %v1057_v4 = vmul.f32 %v1056_v19, %v1039_v21  ;;  %v1280_v19 = vld [vmem:[#allocation10 + $0xe8] sm:$0xff] }
 0x230   : > { %v1312_v21 = vld [vmem:[#allocation10 + $0x1e8] sm:$0xff] }
 0x231   : > { %798 = vmatpush.msra.mxu3 %v486_v40  ;;  %v1058_v28 = vmul.f32 %v1057_v4, %v2260_v24  ;;  %v1309_v4 = vld [vmem:[#allocation10 + $0x1d0] sm:$0xff] }
 0x233   : > { %799 = vmatpush.msra.mxu3 %v480_v43 }
 0x235   : > { %800 = vmatpush.msra.mxu3 %v474_v45 }
 0x237   : > { %801 = vmatpush.msra.mxu3 %v468_v49 }
 0x239   : > { %802 = vmatpush.msra.mxu3 %v462_v52 }
 0x23a   : > { %803 = vmatmul.f32.vlgmr.msra.gmra.mxu3 %v2233_v51 }
 0x253   : > { %1042 = vadd.xlane.f32.xlu2 %v1041_v55 }
 0x26c   : > { %v953_v57 = vpop.permute.xlu2 %952 }
 0x274   : > { %v956_v58 = vpop.permute.xlu2 %955 }
 0x275   : > { %1648 = vmatpush.xpose.msk.msrb.mxu2 %vm808_vm0, %v956_v58 }
 0x278   : > { %1649 = vmatmul.msk.f32.vlgmr.msrb.gmra.mxu2 %vm808_vm0, %v953_v57 }
 0x27c   : > { %v1172_v46 = vpop.permute.xlu2 %1171 }
 0x27d   : > { %1656 = vmatpush.xpose.msk.msra.mxu2 %vm808_vm0, %v1172_v46 }
 0x284   : > { %v1169_v59 = vpop.permute.xlu2 %1168 }
 0x285   : > { %1657 = vmatmul.msk.f32.vlgmr.msra.gmra.mxu2 %vm808_vm0, %v1169_v59 }
 0x2aa   : > { %v764_v14 = vpop.f32.mrf.mxu1 }
 0x2ab   : > { %v765_v15 = vadd.f32 %v764_v14, %v745_v20  ;;  %v1313_v14 = vld [vmem:[#allocation10 + $0x1f0] sm:$0xff] }
 0x2ad   : > { %902 = vmatpush.msrb.mxu1 %v765_v15 }
 0x2af   : > { %v784_v10 = vpop.f32.mrf.mxu2 }
 0x2b0   : > { %v785_v13 = vadd.f32 %v784_v10, %v560_v1 }
 0x2bd   : > { %v804_v16 = vpop.f32.mrf.mxu3 }
 0x2be   : > { %v805_v18 = vadd.f32 %v804_v16, %v785_v13  ;;  %v1281_v13 = vld [vmem:[#allocation10 + $0xf0] sm:$0xff]  ;;  %v1314_v16 = vld [vmem:[#allocation10 + $0x1f8] sm:$0xff] }
 0x2c0   : > { %1118 = vmatpush.msra.mxu1 %v805_v18 }
 0x2c6   : > { %v1043_v62 = vpop.xlane.xlu2 %1042 }
 0x2c7   : > { %v1044_v51 = vmax.f32 %v1043_v62, 1e-24 }
 0x2c9   : > { %1779 = vrsqrt.f32 %v1044_v51  ;;  %vm1051_vm8 = vweird.f32 %v1044_v51 }
 0x2cf   : > { %v1780_v3 = vpop.eup %1779 }
 0x2d0   : > { %v1046_v7 = vmul.f32 %v1780_v3, %v1044_v51  ;;  %vm1052_vm7 = vweird.f32 %v1780_v3 }
 0x2d1   : > { %vm1053_vm9 = vmor %vm1051_vm8, %vm1052_vm7 }
 0x2d2   : > { %v1047_v8 = vmul.f32 %v1780_v3, %v1046_v7 }
 0x2d4   : > { %v1048_v11 = vmul.f32 0.5, %v1047_v8 }
 0x2d6   : > { %v1049_v17 = vsub.f32 1.5, %v1048_v11 }
 0x2d8   : > { %v1050_v25 = vmul.f32 %v1780_v3, %v1049_v17  ;;  %v1279_v17 = vld [vmem:[#allocation10 + $0xe0] sm:$0xff] }
 0x2da   : > { %v1054_v26 = vsel %vm1053_vm9, %v1780_v3, %v1050_v25  ;;  %v1277_v25 = vld [vmem:[#allocation10 + $0xd0] sm:$0xff] }
 0x2db   : > { %v1059_v27 = vmul.f32 %v1054_v26, %v2254_v22  ;;  %v866_v22 = vpop.f32.mrf.mxu0  ;;  %v1278_v26 = vld [vmem:[#allocation10 + $0xd8] sm:$0xff] }
 0x2dc   : > { %v870_v33 = vsel %vm869_vm10, %v866_v22, -inf }
 0x2dd   : > { %1652 = vmatpush.xpose.msk.msra.mxu0 %vm808_vm0, %v1059_v27  ;;  %v1310_v27 = vld [vmem:[#allocation10 + $0x1d8] sm:$0xff] }
 0x2e0   : > { %1653 = vmatmul.msk.f32.vlgmr.msra.gmra.mxu0 %vm808_vm0, %v1058_v28  ;;  %v1275_v28 = vld [vmem:[#allocation10 + $0xc0] sm:$0xff] }
 0x2e1   : > { %1315 = vmatpush.msrb.mxu0 %v1281_v13  ;;  %v1283_v13 = vld [vmem:[#allocation10 + $0x100] sm:$0xff] }
 0x2e3   : > { %1316 = vmatpush.msrb.mxu0 %v1279_v17 }
 0x2e5   : > { %1317 = vmatpush.msrb.mxu0 %v1277_v25 }
 0x2e7   : > { %1318 = vmatpush.msrb.mxu0 %v1275_v28 }
 0x2fb   : > { %v978_v29 = vpop.f32.mrf.mxu2 }
 0x2fc   : > { %v981_v30 = vsel %vm869_vm10, %v978_v29, -inf }
 0x2fd   : > { %982 = vmax.xlane.f32.xlu1 %v981_v30  ;;  %v1276_v30 = vld [vmem:[#allocation10 + $0xc8] sm:$0xff] }
 0x308   : > { %v1194_v31 = vpop.f32.mrf.mxu2 }
 0x309   : > { %v1197_v32 = vsel %vm869_vm10, %v1194_v31, -inf }
 0x30a   : > { %1198 = vmax.xlane.f32.xlu0 %v1197_v32  ;;  %v1273_v32 = vld [vmem:[#allocation10 + $0xb0] sm:$0xff] }
 0x30b   : > { %1319 = vmatpush.msrb.mxu0 %v1273_v32 }
 0x316   : > { %996 = vrot.lane.b32.xlu1 %v765_v15, %s2042_s9  ;;  %v1282_v15 = vld [vmem:[#allocation10 + $0xf8] sm:$0xff] }
 0x317   : > { %1355 = vmatpush.msrb.mxu2 %v1282_v15  ;;  %v1252_v15 = vld [vmem:[#allocation10 + $0x8] sm:$0xff] }
 0x319   : > { %1356 = vmatpush.msrb.mxu2 %v1280_v19 }
 0x31b   : > { %1357 = vmatpush.msrb.mxu2 %v1278_v26 }
 0x31d   : > { %1358 = vmatpush.msrb.mxu2 %v1276_v30 }
 0x31e   : > { %1212 = vrot.lane.b32.xlu0 %v805_v18, %s2042_s9  ;;  %v1311_v18 = vld [vmem:[#allocation10 + $0x1e0] sm:$0xff] }
 0x340   : > { %871 = vmax.xlane.f32.xlu1 %v870_v33  ;;  %v1274_v33 = vld [vmem:[#allocation10 + $0xb8] sm:$0xff] }
 0x341   : > { %1359 = vmatpush.msrb.mxu2 %v1274_v33 }
 0x35d   : > { %v1083_v24 = vpop.f32.mrf.mxu0 }
 0x35e   : > { %v1086_v34 = vsel %vm869_vm10, %v1083_v24, -inf }
 0x35f   : > { %1087 = vmax.xlane.f32.xlu0 %v1086_v34  ;;  %v1271_v34 = vld [vmem:[#allocation10 + $0xa0] sm:$0xff] }
 0x360   : > { %1320 = vmatpush.msrb.mxu0 %v1271_v34 }
 0x370   : > { %v983_v35 = vpop.xlane.xlu1 %982 }
 0x371   : > { %v987_v36 = vsub.f32 %v978_v29, %v983_v35  ;;  %v984_v46 = vsub.f32 -inf, %v983_v35  ;;  %v1307_v29 = vld [vmem:[#allocation10 + $0x1c0] sm:$0xff] }
 0x372   : > { %v1303_v35 = vld [vmem:[#allocation10 + $0x1a0] sm:$0xff] }
 0x373   : > { %v988_v37 = vmul.f32 1.442695, %v987_v36  ;;  %v985_v23 = vmul.f32 1.442695, %v984_v46  ;;  %v1272_v36 = vld [vmem:[#allocation10 + $0xa8] sm:$0xff]  ;;  %v1293_v46 = vld [vmem:[#allocation10 + $0x150] sm:$0xff] }
 0x374   : > { %1360 = vmatpush.msrb.mxu2 %v1272_v36 }
 0x375   : > { %1781 = vpow2.f32 %v988_v37  ;;  %v1304_v37 = vld [vmem:[#allocation10 + $0x1a8] sm:$0xff] }
 0x37b   : > { %v1782_v38 = vpop.eup %1781 }
 0x37c   : > { %v991_v40 = vsel %vm869_vm10, %v1782_v38, 0.0 }
 0x37d   : > { %v1199_v39 = vpop.xlane.xlu0 %1198  ;;  %992 = vadd.xlane.f32.xlu2 %v991_v40  ;;  %v1270_v40 = vld [vmem:[#allocation10 + $0x98] sm:$0xff] }
 0x37e   : > { %v1203_v41 = vsub.f32 %v1194_v31, %v1199_v39  ;;  %v1200_v59 = vsub.f32 -inf, %v1199_v39  ;;  %v1308_v31 = vld [vmem:[#allocation10 + $0x1c8] sm:$0xff]  ;;  %v1301_v39 = vld [vmem:[#allocation10 + $0x190] sm:$0xff]  ;;  %1361 = vmatpush.msrb.mxu2 %v1270_v40 }
 0x380   : > { %v1204_v42 = vmul.f32 1.442695, %v1203_v41  ;;  %v1201_v60 = vmul.f32 1.442695, %v1200_v59  ;;  %v1302_v41 = vld [vmem:[#allocation10 + $0x198] sm:$0xff] }
 0x381   : > { %v1262_v59 = vld [vmem:[#allocation10 + $0x58] sm:$0xff] }
 0x382   : > { %1783 = vpow2.f32 %v1204_v42  ;;  %v1267_v42 = vld [vmem:[#allocation10 + $0x80] sm:$0xff] }
 0x388   : > { %v997_v43 = vpop.permute.xlu1 %996  ;;  %v1784_v44 = vpop.eup %1783 }
 0x389   : > { %1017 = vmatpush.msrb.mxu3 %v997_v43  ;;  %v1207_v45 = vsel %vm869_vm10, %v1784_v44, 0.0  ;;  %v1299_v43 = vld [vmem:[#allocation10 + $0x180] sm:$0xff] }
 0x38a   : > { %1650 = vmatmul.msk.f32.vlgmr.msrb.gmra.mxu3 %vm869_vm10, %v1782_v38  ;;  %1208 = vadd.xlane.f32.xlu2 %v1207_v45  ;;  %v1269_v38 = vld [vmem:[#allocation10 + $0x90] sm:$0xff]  ;;  %v1300_v45 = vld [vmem:[#allocation10 + $0x188] sm:$0xff] }
 0x38b   : > { %1321 = vmatpush.msrb.mxu0 %v1269_v38 }
 0x38d   : > { %1322 = vmatpush.msrb.mxu0 %v1267_v42 }
 0x390   : > { %v1213_v47 = vpop.permute.xlu0 %1212 }
 0x391   : > { %1233 = vmatpush.msra.mxu3 %v1213_v47  ;;  %v1265_v47 = vld [vmem:[#allocation10 + $0x70] sm:$0xff] }
 0x392   : > { %1658 = vmatmul.msk.f32.vlgmr.msra.gmra.mxu3 %vm869_vm10, %v1784_v44  ;;  %v1268_v44 = vld [vmem:[#allocation10 + $0x88] sm:$0xff]  ;;  %1323 = vmatpush.msrb.mxu0 %v1265_v47  ;;  %v2043_v47 = vmov 256.0  }
 0x393   : > { %1375 = vmatpush.msrb.mxu3 %v1314_v16  ;;  %1362 = vmatpush.msrb.mxu2 %v1268_v44  ;;  %v1284_v16 = vld [vmem:[#allocation10 + $0x108] sm:$0xff] }
 0x395   : > { %1376 = vmatpush.msrb.mxu3 %v1312_v21 }
 0x397   : > { %1377 = vmatpush.msrb.mxu3 %v1310_v27 }
 0x399   : > { %1378 = vmatpush.msrb.mxu3 %v1308_v31 }
 0x3b3   : > { %v2362_v48 = vpop.xlane.xlu1 %871 }
 0x3b4   : > { %v876_v49 = vsub.f32 %v866_v22, %v2362_v48  ;;  %v1305_v22 = vld [vmem:[#allocation10 + $0x1b0] sm:$0xff] }
 0x3b6   : > { %v877_v50 = vmul.f32 1.442695, %v876_v49  ;;  %v1297_v49 = vld [vmem:[#allocation10 + $0x170] sm:$0xff] }
 0x3b8   : > { %1785 = vpow2.f32 %v877_v50  ;;  %v1266_v50 = vld [vmem:[#allocation10 + $0x78] sm:$0xff] }
 0x3b9   : > { %1363 = vmatpush.msrb.mxu2 %v1266_v50 }
 0x3be   : > { %v1786_v52 = vpop.eup %1785 }
 0x3bf   : > { %1646 = vmatmul.msk.f32.vlgmr.msrb.gmra.mxu1 %vm869_vm10, %v1786_v52  ;;  %v880_v53 = vsel %vm869_vm10, %v1786_v52, 0.0  ;;  %v1298_v52 = vld [vmem:[#allocation10 + $0x178] sm:$0xff] }
 0x3c0   : > { %881 = vadd.xlane.f32.xlu2 %v880_v53  ;;  %1335 = vmatpush.msrb.mxu1 %v1313_v14  ;;  %v1263_v53 = vld [vmem:[#allocation10 + $0x60] sm:$0xff] }
 0x3c1   : > { %1324 = vmatpush.msrb.mxu0 %v1263_v53 }
 0x3c2   : > { %1336 = vmatpush.msrb.mxu1 %v1311_v18 }
 0x3c4   : > { %1337 = vmatpush.msrb.mxu1 %v1309_v4 }
 0x3c6   : > { %1338 = vmatpush.msrb.mxu1 %v1307_v29 }
 0x3c8   : > { %1339 = vmatpush.msrb.mxu1 %v1305_v22 }
 0x3ca   : > { %1340 = vmatpush.msrb.mxu1 %v1303_v35 }
 0x3cc   : > { %1341 = vmatpush.msrb.mxu1 %v1301_v39 }
 0x3ce   : > { %1342 = vmatpush.msrb.mxu1 %v1299_v43 }
 0x3d0   : > { %1343 = vmatpush.msrb.mxu1 %v1297_v49 }
 0x3d2   : > { %v2367_v54 = vpop.xlane.xlu0 %1087 }
 0x3d3   : > { %v1092_v55 = vsub.f32 %v1083_v24, %v2367_v54  ;;  %v1306_v24 = vld [vmem:[#allocation10 + $0x1b8] sm:$0xff]  ;;  %v1089_v14 = vsub.f32 -inf, %v2367_v54 }
 0x3d4   : > { %1379 = vmatpush.msrb.mxu3 %v1306_v24 }
 0x3d5   : > { %v1093_v56 = vmul.f32 1.442695, %v1092_v55  ;;  %v1295_v55 = vld [vmem:[#allocation10 + $0x160] sm:$0xff]  ;;  %v1090_v18 = vmul.f32 1.442695, %v1089_v14 }
 0x3d6   : > { %1380 = vmatpush.msrb.mxu3 %v1304_v37  ;;  %1344 = vmatpush.msrb.mxu1 %v1295_v55 }
 0x3d7   : > { %1787 = vpow2.f32 %v1093_v56  ;;  %v1264_v56 = vld [vmem:[#allocation10 + $0x68] sm:$0xff] }
 0x3d8   : > { %1789 = vpow2.f32 %v985_v23  ;;  %1381 = vmatpush.msrb.mxu3 %v1302_v41  ;;  %v1294_v23 = vld [vmem:[#allocation10 + $0x158] sm:$0xff]  ;;  %1364 = vmatpush.msrb.mxu2 %v1264_v56 }
 0x3d9   : > { %1791 = vpow2.f32 %v1201_v60  ;;  %v1259_v60 = vld [vmem:[#allocation10 + $0x40] sm:$0xff]  ;;  %1345 = vmatpush.msrb.mxu1 %v1293_v46 }
 0x3da   : > { %1382 = vmatpush.msrb.mxu3 %v1300_v45  ;;  %1365 = vmatpush.msrb.mxu2 %v1262_v59 }
 0x3dc   : > { %1383 = vmatpush.msrb.mxu3 %v1298_v52 }
 0x3dd   : > { %v1788_v57 = vpop.eup %1787 }
 0x3de   : > { %1654 = vmatmul.msk.f32.vlgmr.msra.gmra.mxu1 %vm869_vm10, %v1788_v57  ;;  %v1096_v58 = vsel %vm869_vm10, %v1788_v57, 0.0  ;;  %v1790_v12 = vpop.eup %1789  ;;  %v1296_v57 = vld [vmem:[#allocation10 + $0x168] sm:$0xff] }
 0x3df   : > { %1097 = vadd.xlane.f32.xlu2 %v1096_v58  ;;  %v1792_v62 = vpop.eup %1791  ;;  %v990_v63 = vmul.f32 0.0, %v1790_v12  ;;  %v1261_v58 = vld [vmem:[#allocation10 + $0x50] sm:$0xff]  ;;  %1384 = vmatpush.msrb.mxu3 %v1296_v57  ;;  %v1260_v12 = vld [vmem:[#allocation10 + $0x48] sm:$0xff] }
 0x3e0   : > { %v1206_v0 = vmul.f32 0.0, %v1792_v62  ;;  %1325 = vmatpush.msrb.mxu0 %v1261_v58  ;;  %v1292_v62 = vld [vmem:[#allocation10 + $0x148] sm:$0xff]  ;;  %1366 = vmatpush.msrb.mxu2 %v1260_v12 }
 0x3e1   : > { %1385 = vmatpush.msrb.mxu3 %v1294_v23 }
 0x3e2   : > { %1326 = vmatpush.msrb.mxu0 %v1259_v60 }
 0x3e3   : > { %1386 = vmatpush.msrb.mxu3 %v1292_v62 }
 0x3f0   : > { %v993_v61 = vpop.xlane.xlu2 %992 }
 0x3f1   : > { %v994_v2 = vadd.f32 %v993_v61, %v990_v63  ;;  %v1291_v61 = vld [vmem:[#allocation10 + $0x140] sm:$0xff] }
 0x3f2   : > { %1346 = vmatpush.msrb.mxu1 %v1291_v61 }
 0x3f3   : > { %1793 = vrcp.f32 %v994_v2  ;;  %v1290_v2 = vld [vmem:[#allocation10 + $0x138] sm:$0xff] }
 0x3f4   : > { %1387 = vmatpush.msrb.mxu3 %v1290_v2 }
 0x3f9   : > { %v1794_v1 = vpop.eup %1793 }
 0x3fd   : > { %v1209_v51 = vpop.xlane.xlu2 %1208 }
 0x3fe   : > { %v1210_v3 = vadd.f32 %v1209_v51, %v1206_v0  ;;  %v1289_v51 = vld [vmem:[#allocation10 + $0x130] sm:$0xff] }
 0x3ff   : > { %1347 = vmatpush.msrb.mxu1 %v1289_v51 }
 0x400   : > { %1795 = vrcp.f32 %v1210_v3  ;;  %v1255_v3 = vld [vmem:[#allocation10 + $0x20] sm:$0xff] }
 0x406   : > { %v1796_v8 = vpop.eup %1795 }
 0x40d   : > { %v1019_v5 = vpop.f32.mrf.mxu3 }
 0x40e   : > { %v1022_v6 = vadd.f32 %v1019_v5, %v990_v63  ;;  %v1257_v63 = vld [vmem:[#allocation10 + $0x30] sm:$0xff]  ;;  %v1287_v5 = vld [vmem:[#allocation10 + $0x120] sm:$0xff] }
 0x40f   : > { %1327 = vmatpush.msrb.mxu0 %v1257_v63  ;;  %1348 = vmatpush.msrb.mxu1 %v1287_v5  ;;  %v1427_v5 = vld [vmem:[%s2425_s5] sm:$0x3] }
 0x410   : > { %v1024_v9 = vmul.f32 %v1794_v1, %v1022_v6  ;;  %v1256_v6 = vld [vmem:[#allocation10 + $0x28] sm:$0xff]  ;;  %v1253_v1 = vld [vmem:[#allocation10 + $0x10] sm:$0xff] }
 0x411   : > { %1328 = vmatpush.msrb.mxu0 %v1255_v3 }
 0x413   : > { %1329 = vmatpush.msrb.mxu0 %v1253_v1  ;;  %v1435_v1 = vld [vmem:[%s2426_s6] sm:$0x3] }
 0x414   : > { %v1438_v14 = vperm.slane %v1435_v1, 1 }
 0x415   : > { %v1235_v7 = vpop.f32.mrf.mxu3 }
 0x416   : > { %v1238_v20 = vadd.f32 %v1235_v7, %v1206_v0  ;;  %v1258_v0 = vld [vmem:[#allocation10 + $0x38] sm:$0xff]  ;;  %v1288_v7 = vld [vmem:[#allocation10 + $0x128] sm:$0xff] }
 0x417   : > { %1367 = vmatpush.msrb.mxu2 %v1258_v0  ;;  %1388 = vmatpush.msrb.mxu3 %v1288_v7 }
 0x418   : > { %v1240_v10 = vmul.f32 %v1796_v8, %v1238_v20  ;;  %v1285_v20 = vld [vmem:[#allocation10 + $0x110] sm:$0xff]  ;;  %v1254_v8 = vld [vmem:[#allocation10 + $0x18] sm:$0xff] }
 0x419   : > { %1368 = vmatpush.msrb.mxu2 %v1256_v6  ;;  %1349 = vmatpush.msrb.mxu1 %v1285_v20  ;;  %v1429_v20 = vperm.slane %v1427_v5, 0 }
 0x41a   : > { %v1760_v11 = vpack.i.bf16 %v1240_v10, %v1024_v9  ;;  %v873_v9 = vsub.f32 -inf, %v2362_v48  ;;  %v1286_v10 = vld [vmem:[#allocation10 + $0x118] sm:$0xff] }
 0x41b   : > { %1369 = vmatpush.msrb.mxu2 %v1254_v8  ;;  %1389 = vmatpush.msrb.mxu3 %v1286_v10  ;;  %v1430_v8 = vperm.slane %v1427_v5, 1 }
 0x41c   : > { %1761 = vrot.lane.b32.xlu2 %v1760_v11, %s2042_s9  ;;  %v1251_v11 = vld [vmem:[#allocation10] sm:$0xff]  ;;  %1350 = vmatpush.msrb.mxu1 %v1283_v13  ;;  %v874_v17 = vmul.f32 1.442695, %v873_v9  ;;  %v1437_v13 = vperm.slane %v1435_v1, 0  ;;  %s1515_s9 = sshll.u32 %s1511_s2, 4  ;;  %s1516_s9 = int_to_ptr.hbm [resolvable:$true] %s1515_s9 }
 0x41d   : > { %1330 = vmatpush.msrb.mxu0 %v1251_v11  ;;  %1370 = vmatpush.msrb.mxu2 %v1252_v15  ;;  %s1968_s12 = sshra.s32 %s1516_s9, 4  ;;  %s1969_s12 = int_to_ptr.hbm [resolvable:$true] %s1968_s12 }
 0x41e   : > { %1390 = vmatpush.msrb.mxu3 %v1284_v16  ;;  %1797 = vpow2.f32 %v874_v17  ;;  %s1970_s13 = scalar_lea.hbm %s1969_s12, 16  ;;  %p1975_p12 = scmp.lt.s32.totalorder %s1969_s12, %s2427_s7 }
 0x41f   : > { %1799 = vpow2.f32 %v1090_v18  ;;  %p1971_p1 = scmp.ne.s32.totalorder %s1969_s12, %s1970_s13  ;;  %p1976_p7 = scmp.lt.s32.totalorder %s1974_s14, %s1970_s13 }
 0x421   : > { %p1972_p3 = pnand %p1971_p1, %p2172_p4  ;;  %p1977_p8 = por %p1976_p7, %p1975_p12 }
 0x423   : > { %p1973_p5 = pneg %p1972_p3 }
 0x424   : > { %v1798_v19 = vpop.eup %1797 }
 0x425   : > { %v1800_v21 = vpop.eup %1799  ;;  %v879_v4 = vmul.f32 0.0, %v1798_v19  ;;  %p1978_p9 = pnand %p1977_p8, %p1973_p5 }
 0x426   : > { %v1095_v27 = vmul.f32 0.0, %v1800_v21  ;;  %v1818_v21 = vld [vmem:[%s2213_s11 + $0x8] sm:$0xff] }
 0x433   : > { %v882_v48 = vpop.xlane.xlu2 %881 }
 0x434   : > { %v883_v54 = vadd.f32 %v882_v48, %v879_v4  ;;  %v1817_v48 = vld [vmem:[%s2213_s11] sm:$0xff]  ;;  %s358_s11 = scalar_lea.vmem [#allocation12], %s1639_s0 }
 0x435   : > { %s1513_s8 = sshll.u32 %s358_s11, 4  ;;  %s1514_s8 = int_to_ptr.vmem [resolvable:$true] %s1513_s8 }
 0x436   : > { %1801 = vrcp.f32 %v883_v54 }
 0x43c   : > { %v904_v25 = vpop.f32.mrf.mxu1  ;;  %v1802_v32 = vpop.eup %1801 }
 0x43d   : > { %v907_v30 = vadd.f32 %v904_v25, %v879_v4 }
 0x43f   : > { %v909_v24 = vmul.f32 %v1802_v32, %v907_v30 }
 0x452   : > { %v1098_v26 = vpop.xlane.xlu2 %1097 }
 0x453   : > { %v1099_v28 = vadd.f32 %v1098_v26, %v1095_v27 }
 0x455   : > { %1803 = vrcp.f32 %v1099_v28 }
 0x456   : > { %1805 = vrcp.f32 %v2043_v47 }
 0x45b   : > { %v1120_v29 = vpop.f32.mrf.mxu1  ;;  %v1804_v22 = vpop.eup %1803 }
 0x45c   : > { %v1123_v31 = vadd.f32 %v1120_v29, %v1095_v27  ;;  %v1806_v49 = vpop.eup %1805 }
 0x45d   : > { %v1399_v50 = vmul.f32 256.0, %v1806_v49 }
 0x45e   : > { %v1125_v34 = vmul.f32 %v1804_v22, %v1123_v31 }
 0x45f   : > { %v1400_v52 = vsub.f32 1.0, %v1399_v50 }
 0x461   : > { %v1401_v53 = vmul.f32 %v1806_v49, %v1400_v52 }
 0x463   : > { %v1402_v55 = vadd.f32 %v1806_v49, %v1401_v53 }
 0x476   : > { %v1762_v33 = vpop.permute.xlu2 %1761 }
 0x477   : > { %v1764_v35 = vunpack.i.h.bf16 %v1762_v33  ;;  %v1763_v36 = vunpack.i.l.bf16 %v1762_v33 }
 0x479   : > { %v1249_v37 = vsel %vm808_vm0, %v909_v24, %v1763_v36  ;;  %v1250_v38 = vsel %vm808_vm0, %v1125_v34, %v1764_v35  ;;  %vm1403_vm0 = vweird.f32 %v1806_v49 }
 0x47a   : > { %1331 = vmatmul.f32.vlgmr.msrb.gmra.mxu0 %v1249_v37  ;;  %1351 = vmatmul.f32.vlgmr.msrb.gmra.mxu1 %v1250_v38  ;;  %v1404_v56 = vsel %vm1403_vm0, %v1806_v49, %v1402_v55 }
 0x47b   : > { %1371 = vmatmul.f32.vlgmr.msrb.gmra.mxu2 %v1249_v37  ;;  %1391 = vmatmul.f32.vlgmr.msrb.gmra.mxu3 %v1250_v38 }
 0x4f7   : > { %v1332_v39 = vpop.f32.mrf.mxu0  ;;  %v1352_v40 = vpop.f32.mrf.mxu1 }
 0x4f8   : > { %v1353_v43 = vadd.f32 %v1352_v40, %v1332_v39 }
 0x4fe   : > { %v1372_v41 = vpop.f32.mrf.mxu2  ;;  %v1392_v42 = vpop.f32.mrf.mxu3 }
 0x4ff   : > { %v1393_v44 = vadd.f32 %v1392_v42, %v1372_v41 }
 0x501   : > { %v1395_v45 = vadd.f32 %v1393_v44, %v1353_v43 }
 0x503   : > { %1396 = vadd.xlane.f32.xlu1 %v1395_v45 }
 0x576   : > { %v1397_v57 = vpop.xlane.xlu1 %1396 }
 0x577   : > { %v1405_v58 = vmul.f32 %v1404_v56, %v1397_v57 }
 0x579   : > { %v1406_v46 = vsub.f32 %v1353_v43, %v1405_v58  ;;  %v1407_v59 = vsub.f32 %v1393_v44, %v1405_v58 }
 0x57b   : > { %v1408_v23 = vmul.f32 %v1406_v46, %v1406_v46  ;;  %v1409_v60 = vmul.f32 %v1407_v59, %v1407_v59 }
 0x57d   : > { %v1410_v61 = vadd.f32 %v1409_v60, %v1408_v23 }
 0x57f   : > { %1411 = vadd.xlane.f32.xlu0 %v1410_v61 }
 0x5f2   : > { %v1412_v12 = vpop.xlane.xlu0 %1411 }
 0x5f3   : > { %v1413_v62 = vmul.f32 %v1412_v12, %v1404_v56 }
 0x5f5   : > { %v1414_v63 = vadd.f32 1e-05, %v1413_v62  ;;  %v2044_v62 = vmov -1.0  }
 0x5f7   : > { %1807 = vrsqrt.f32 %v1414_v63  ;;  %vm1421_vm12 = vweird.f32 %v1414_v63 }
 0x5fd   : > { %v1808_v51 = vpop.eup %1807 }
 0x5fe   : > { %v1416_v0 = vmul.f32 %v1808_v51, %v1414_v63  ;;  %vm1422_vm11 = vweird.f32 %v1808_v51 }
 0x5ff   : > { %vm1423_vm13 = vmor %vm1421_vm12, %vm1422_vm11 }
 0x600   : > { %v1417_v2 = vmul.f32 %v1808_v51, %v1416_v0 }
 0x602   : > { %v1418_v3 = vmul.f32 0.5, %v1417_v2 }
 0x604   : > { %v1419_v6 = vsub.f32 1.5, %v1418_v3 }
 0x606   : > { %v1420_v7 = vmul.f32 %v1808_v51, %v1419_v6 }
 0x608   : > { %v1424_v9 = vsel %vm1423_vm13, %v1808_v51, %v1420_v7 }
 0x609   : > { %v1425_v10 = vmul.f32 %v1424_v9, %v1406_v46  ;;  %v1426_v11 = vmul.f32 %v1424_v9, %v1407_v59 }
 0x60b   : > { %v1433_v15 = vmul.f32 %v1429_v20, %v1425_v10  ;;  %v1434_v16 = vmul.f32 %v1430_v8, %v1426_v11 }
 0x60d   : > { %v1441_v17 = vadd.f32 %v1437_v13, %v1433_v15  ;;  %v1442_v18 = vadd.f32 %v1438_v14, %v1434_v16 }
 0x60f   : > { %v1443_v19 = vadd.f32 %v1817_v48, %v1441_v17  ;;  %v1444_v25 = vadd.f32 %v1818_v21, %v1442_v18 }
 0x611   : > { %v1447_v4 = vmul.f32 0.70710677, %v1443_v19  ;;  %v1448_v26 = vmul.f32 0.70710677, %v1444_v25  ;;  %v1445_v5 = vmul.f32 0.5, %v1443_v19  ;;  %v1446_v7 = vmul.f32 0.5, %v1444_v25 }
 0x613   : > { %v1453_v27 = vand.u32 2147483647, %v1447_v4  ;;  %v1454_v54 = vand.u32 2147483647, %v1448_v26  ;;  %vm1449_vm14 = vcmp.ge.f32.partialorder %v1447_v4, 0.0  ;;  %vm1450_vm15 = vcmp.ge.f32.partialorder %v1448_v26, 0.0 }
 0x614   : > { %v1451_v63 = vsel %vm1449_vm14, 1.0, %v2044_v62  ;;  %v1452_v0 = vsel %vm1450_vm15, 1.0, %v2044_v62 }
 0x615   : > { %v1455_v28 = vmul.f32 0.3275911, %v1453_v27  ;;  %v1456_v29 = vmul.f32 0.3275911, %v1454_v54  ;;  %v1479_v22 = vsub.f32 0.0, %v1453_v27  ;;  %v1480_v34 = vsub.f32 0.0, %v1454_v54 }
 0x617   : > { %v1457_v30 = vadd.f32 1.0, %v1455_v28  ;;  %v1458_v31 = vadd.f32 1.0, %v1456_v29  ;;  %v1481_v38 = vmul.f32 %v1479_v22, %v1453_v27  ;;  %v1482_v40 = vmul.f32 %v1480_v34, %v1454_v54 }
 0x619   : > { %1809 = vrcp.f32 %v1457_v30  ;;  %v1483_v44 = vmul.f32 1.442695, %v1481_v38  ;;  %v1485_v47 = vmul.f32 1.442695, %v1482_v40 }
 0x61a   : > { %1811 = vrcp.f32 %v1458_v31 }
 0x61b   : > { %1813 = vpow2.f32 %v1483_v44 }
 0x61c   : > { %1815 = vpow2.f32 %v1485_v47 }
 0x61f   : > { %v1810_v32 = vpop.eup %1809 }
 0x620   : > { %v1812_v33 = vpop.eup %1811  ;;  %v1461_v24 = vmul.f32 1.0614054, %v1810_v32 }
 0x621   : > { %v1462_v35 = vmul.f32 1.0614054, %v1812_v33  ;;  %v1814_v46 = vpop.eup %1813 }
 0x622   : > { %v1463_v36 = vadd.f32 -1.4531521, %v1461_v24  ;;  %v1816_v23 = vpop.eup %1815 }
 0x623   : > { %v1464_v37 = vadd.f32 -1.4531521, %v1462_v35 }
 0x624   : > { %v1465_v39 = vmul.f32 %v1810_v32, %v1463_v36 }
 0x625   : > { %v1466_v41 = vmul.f32 %v1812_v33, %v1464_v37 }
 0x626   : > { %v1467_v42 = vadd.f32 1.4214138, %v1465_v39 }
 0x627   : > { %v1468_v43 = vadd.f32 1.4214138, %v1466_v41 }
 0x628   : > { %v1469_v45 = vmul.f32 %v1810_v32, %v1467_v42 }
 0x629   : > { %v1470_v49 = vmul.f32 %v1812_v33, %v1468_v43 }
 0x62a   : > { %v1471_v50 = vadd.f32 -0.28449672, %v1469_v45 }
 0x62b   : > { %v1472_v52 = vadd.f32 -0.28449672, %v1470_v49 }
 0x62c   : > { %v1473_v53 = vmul.f32 %v1810_v32, %v1471_v50 }
 0x62d   : > { %v1474_v55 = vmul.f32 %v1812_v33, %v1472_v52 }
 0x62e   : > { %v1475_v56 = vadd.f32 0.2548296, %v1473_v53 }
 0x62f   : > { %v1476_v57 = vadd.f32 0.2548296, %v1474_v55 }
 0x630   : > { %v1477_v58 = vmul.f32 %v1810_v32, %v1475_v56 }
 0x631   : > { %v1478_v59 = vmul.f32 %v1812_v33, %v1476_v57 }
 0x632   : > { %v1487_v60 = vmul.f32 %v1814_v46, %v1477_v58 }
 0x633   : > { %v1488_v61 = vmul.f32 %v1816_v23, %v1478_v59 }
 0x634   : > { %v1489_v12 = vsub.f32 1.0, %v1487_v60 }
 0x635   : > { %v1490_v51 = vsub.f32 1.0, %v1488_v61 }
 0x636   : > { %v1491_v2 = vmul.f32 %v1489_v12, %v1451_v63 }
 0x637   : > { %v1492_v3 = vmul.f32 %v1490_v51, %v1452_v0 }
 0x638   : > { %v1493_v6 = vadd.f32 1.0, %v1491_v2 }
 0x639   : > { %v1494_v1 = vadd.f32 1.0, %v1492_v3 }
 0x63a   : > { %v1495_v20 = vmul.f32 %v1493_v6, %v1445_v5 }
 0x63b   : > { %v1496_v8 = vmul.f32 %v1494_v1, %v1446_v7 }
 0x63c   : > { %1497 = vst [vmem:[%s358_s11] sm:$0xff] %v1495_v20 }
 0x63d   : > { %1498 = vst [vmem:[%s358_s11 + $0x8] sm:$0xff] %v1496_v8 }
 0x63e   : > { %1981 = shalt.err (!%p1978_p9)
}
 0x63f   : > { %1684 = dma.vmem_to_hbm [thread:$0]  (%p2172_p4), %s1514_s8, 256, %s1516_s9, %s1500_s15  }
 0x640 PF: > { %s1527_s21 = sand.u32 1, %s2020_s24   ;;  %p2439_p10 = scmp.ge.s32.totalorder %s2032_s27, 2 }
 0x641   : > { %s1528_s29 = scalar_lea.sflag [#allocation4], %s1527_s21 }
 0x642   : > { %p1704_p13 = pnand %p2439_p10, %p2176_p6 }
 0x644   : > { %p1705_p11 = pneg %p1704_p13 }
 0x646   : > { %2015 = dma.done.wait (%p1705_p11), %s1528_s29, 256  }
 0x647   : > { %2017 = vsyncadd (%p1705_p11), %s1528_s29, 4294967040  ;;  %p23_p0 = scmp.ge.s32.totalorder %s2146_s16, 4   ;;  %s2440_s24 = smov %s2024_s25 }
 0x648   : > { %s2441_s25 = smov %s2028_s26  ;;  %s2442_s26 = smov %s2157_s18 }
 0x649   : > { %s2443_s27 = smov %s2146_s16  ;;  %25 = sbr.rel (!%p23_p0) target bundleno = 11 (0xb), region = 110 }
 0x64e   :  { %1534 = vsyncpa [#allocation3], 1 }
 0x64f   :  { %1536 = vsyncpa [#allocation3 + $0x1], 1 }
 0x650   :  { %1537 = vsyncpa [#allocation8], 1 }
 0x651   :  { %1538 = vsyncpa [#allocation11], 1 }
 0x652   :  { %1539 = vsyncpa [#allocation4], 1 }
 0x653   :  { %1541 = vsyncpa [#allocation4 + $0x1], 1 }
 0x654   :  { %1542 = vsyncpa [#allocation5], 1 }
 0x655   :  { %1544 = vsyncpa [#allocation5 + $0x1], 1 }

</bundles_post_ra>
